<compile_context>
chip_gen: v7x
topology: tpu7x:2x2x1
jax: 0.10.0
libtpu: 0.0.40
codegen_flags: <defaults>
</compile_context>

<pallas_src>
import functools

import jax
import jax.numpy as jnp
from jax.experimental import pallas as pl
from jax.experimental.pallas import tpu as pltpu

_LANES = 128


def _divisors_desc(n):
    return [d for d in range(n, 0, -1) if n % d == 0]


def _camera_kernel(x_ref, w_ref, o_ref, *, S_blk, C_blk, C_total, Hk, Wk,
                   Ho, out_w, row_block, multi_step):
    """One grid step handles S_blk frames x C_blk channels of one batch item.

    x_ref: (S_blk, C_blk, Hp, Wp_in) VMEM block (native dtype, upcast here)
    w_ref: (S*C*Hk*Wk,) SMEM taps, pre-scaled by 1/S
    o_ref: (C_blk, Ho, out_w) VMEM, resident across the S-reduction grid axis
    """
    cblk = pl.program_id(1)
    s_step = pl.program_id(2)
    s_base = s_step * S_blk
    kk = Hk * Wk

    for cb in range(C_blk):
        c_abs = cblk * C_blk + cb
        # Hoist scalar tap loads (and their splats) out of the row-block loop.
        taps = [[w_ref[((s_base + s) * C_total + c_abs) * kk + t]
                 for t in range(kk)] for s in range(S_blk)]

        for r0 in range(0, Ho, row_block):
            rows = min(row_block, Ho - r0)
            contrib = jnp.zeros((rows, out_w), jnp.float32)
            for s in range(S_blk):
                for i in range(Hk):
                    # One VMEM load per kernel row; the Wk lane shifts come
                    # from slicing the in-register value (XLU work), not from
                    # Wk separate unaligned ref loads.
                    row = x_ref[s, cb, pl.ds(r0 + i, rows), :].astype(jnp.float32)
                    for j in range(Wk):
                        contrib = contrib + row[:, j:j + out_w] * taps[s][i * Wk + j]

            if not multi_step:
                # S fully folded into this step: single direct store.
                o_ref[cb, pl.ds(r0, rows), :] = contrib
            else:
                @pl.when(s_step == 0)
                def _(contrib=contrib, cb=cb, r0=r0, rows=rows):
                    o_ref[cb, pl.ds(r0, rows), :] = contrib

                @pl.when(s_step > 0)
                def _(contrib=contrib, cb=cb, r0=r0, rows=rows):
                    o_ref[cb, pl.ds(r0, rows), :] += contrib


def camera_model_forward(inputx, weight, if_pad=True):
    """JAX/Pallas equivalent of camera_model.forward.

    inputx: (N, S, C, H, W) or (S, C, H, W);  weight: (S, C, Hk, Wk)
    returns: (N, C, Ho, Wo) (batch dim dropped if input was unbatched).
    """
    not_batch = inputx.ndim == 4
    if not_batch:
        inputx = inputx[None]
    N, S, C, H, W = inputx.shape
    Sk, Ck, Hk, Wk = weight.shape
    assert S * C == Sk * Ck, "weights do not match input channels"

    pad = Hk // 2 if if_pad else 0  # module uses kernel-H//2 for both dims
    Hp = H + 2 * pad
    Ho = Hp - Hk + 1
    Wo = W + 2 * pad - Wk + 1
    assert Ho > 0 and Wo > 0, "PSF kernel larger than (padded) image"

    # Fold the mean over S (1/S) into the taps; flatten for SMEM scalar reads.
    w_flat = (weight.astype(jnp.float32) / jnp.float32(S)).reshape(-1)

    # Lane policy: pad output width to a multiple of 128 only when the relative
    # overhead is small (<= 12.5%); otherwise keep the natural full-extent
    # width (masked tail stores beat 8x wasted DMA for narrow images).
    out_w_padded = ((Wo + _LANES - 1) // _LANES) * _LANES
    out_w = out_w_padded if (Wo >= _LANES and out_w_padded * 8 <= Wo * 9) else Wo
    Wp_in = out_w + Wk - 1

    # Single replicate ("edge") pad in HBM covering both the conv halo and any
    # lane alignment.  TODO(synk): build the halo in-kernel to avoid this copy.
    extra_w = Wp_in - (W + 2 * pad)
    x = inputx
    if pad > 0 or extra_w > 0:
        x = jnp.pad(x, ((0, 0), (0, 0), (0, 0), (pad, pad), (pad, pad + extra_w)),
                    mode="edge")
    # Input stays in its native dtype for the DMA; the kernel upcasts to f32.

    itemsize = jnp.dtype(x.dtype).itemsize
    in_plane = Hp * Wp_in * itemsize
    out_plane = Ho * out_w * 4
    budget = 40 * 1024 * 1024  # block budget, safe under v7x's 64 MiB VMEM

    # Fold as much of S as fits (removes / shortens the reduction axis), then
    # a channel block, keeping the static unroll bounded.
    s_blk = 1
    for d in _divisors_desc(S):
        if d * Hk * Wk <= 1024 and 2 * d * in_plane + 2 * out_plane <= budget:
            s_blk = d
            break
    c_blk = 1
    for d in _divisors_desc(C):
        if (d <= 8 and s_blk * d * Hk * Wk <= 2048
                and 2 * s_blk * d * in_plane + 2 * d * out_plane <= budget):
            c_blk = d
            break

    n_s_steps = S // s_blk
    n_c_blocks = C // c_blk
    multi_step = n_s_steps > 1

    # Bound vreg pressure of the per-row-block accumulator (~24 vregs).
    vregs_per_row = -(-out_w // _LANES)
    row_block = max(8, (24 // vregs_per_row) // 8 * 8)
    row_block = min(row_block, Ho)

    kernel = functools.partial(
        _camera_kernel, S_blk=s_blk, C_blk=c_blk, C_total=C, Hk=Hk, Wk=Wk,
        Ho=Ho, out_w=out_w, row_block=row_block, multi_step=multi_step)

    out = pl.pallas_call(
        kernel,
        out_shape=jax.ShapeDtypeStruct((N, C, Ho, out_w), jnp.float32),
        grid=(N, n_c_blocks, n_s_steps),
        in_specs=[
            # (S_blk, C_blk, Hp, Wp_in) stack of image planes per grid step
            pl.BlockSpec((None, s_blk, c_blk, Hp, Wp_in),
                         lambda n, cb, t: (n, t, cb, 0, 0)),
            # PSF taps live whole in SMEM and are read as scalars
            pl.BlockSpec(memory_space=pltpu.MemorySpace.SMEM),
        ],
        out_specs=pl.BlockSpec((None, c_blk, Ho, out_w),
                               lambda n, cb, t: (n, cb, 0, 0)),
        compiler_params=pltpu.CompilerParams(
            dimension_semantics=("parallel", "parallel", "arbitrary"),
            vmem_limit_bytes=64 * 1024 * 1024,
        ),
    )(x, w_flat)

    out = out[..., :Wo]
    if not_batch:
        out = out[0]
    return out


def _reference(inputx, weight, if_pad=True):
    """Pure-JAX reference mirroring the PyTorch module (correctness check)."""
    N, S, C, H, W = inputx.shape
    Sk, Ck, Hk, Wk = weight.shape
    pad = Hk // 2 if if_pad else 0
    x = inputx.astype(jnp.float32)
    w = weight.astype(jnp.float32)
    if pad > 0:
        x = jnp.pad(x, ((0, 0), (0, 0), (0, 0), (pad, pad), (pad, pad)), mode="edge")
    Ho = H + 2 * pad - Hk + 1
    Wo = W + 2 * pad - Wk + 1
    acc = jnp.zeros((N, S, C, Ho, Wo), jnp.float32)
    for i in range(Hk):
        for j in range(Wk):
            acc = acc + x[:, :, :, i:i + Ho, j:j + Wo] * w[None, :, :, i, j][..., None, None]
    return acc.mean(axis=1)


if __name__ == "__main__":
    key = jax.random.PRNGKey(0)
    k_x, k_w = jax.random.split(key)

    N, S, C, H, W = 2, 2, 4, 16, 16
    Hk = Wk = 3  # odd PSF kernel -> 'same' output spatial size

    inputx = jax.random.normal(k_x, (N, S, C, H, W), dtype=jnp.float32)
    # PSF weights (the module receives these in forward; no learned params)
    psf_w = jax.random.uniform(k_w, (S, C, Hk, Wk), dtype=jnp.float32)

    out = camera_model_forward(inputx, psf_w, if_pad=True)
    out = jax.block_until_ready(out)

    ref = _reference(inputx, psf_w, if_pad=True)
    assert out.shape == (N, C, H, W), out.shape
    assert jnp.allclose(out, ref, atol=1e-5, rtol=1e-5), "mismatch vs reference"

    print("KERNEL_OK")
</pallas_src>

<mosaic_0001>
module attributes {stable_mosaic.version = 11 : i64} {
  func.func @_camera_kernel(%arg0: i32, %arg1: i32, %arg2: i32, %arg3: memref<1x2x4x18x18xf32, #tpu.memory_space<vmem>>, %arg4: memref<72xf32, #tpu.memory_space<smem>>, %arg5: memref<1x4x16x16xf32, #tpu.memory_space<vmem>>) attributes {dimension_semantics = [#tpu.dimension_semantics<parallel>, #tpu.dimension_semantics<parallel>, #tpu.dimension_semantics<arbitrary>], iteration_bounds = array<i64: 2, 1, 1>, scalar_prefetch = 0 : i64, scratch_operands = 0 : i64, tpu.core_type = #tpu.core_type<tc>, window_params = [{transform_indices = @transform_0, window_bounds = array<i64: 1, 2, 4, 18, 18>}, {transform_indices = @transform_1, window_bounds = array<i64: 72>}, {transform_indices = @transform_2, window_bounds = array<i64: 1, 4, 16, 16>}]} {
    %c2_i32 = arith.constant 2 : i32
    %0 = arith.muli %arg2, %c2_i32 : i32
    %c4_i32 = arith.constant 4 : i32
    %1 = arith.muli %arg1, %c4_i32 : i32
    %c0_i32 = arith.constant 0 : i32
    %2 = arith.addi %1, %c0_i32 : i32
    %c0_i32_0 = arith.constant 0 : i32
    %3 = arith.addi %0, %c0_i32_0 : i32
    %c4_i32_1 = arith.constant 4 : i32
    %4 = arith.muli %3, %c4_i32_1 : i32
    %5 = arith.addi %4, %2 : i32
    %c9_i32 = arith.constant 9 : i32
    %6 = arith.muli %5, %c9_i32 : i32
    %c0_i32_2 = arith.constant 0 : i32
    %7 = arith.addi %6, %c0_i32_2 : i32
    %8 = arith.index_cast %7 : i32 to index
    %9 = memref.load %arg4[%8] : memref<72xf32, #tpu.memory_space<smem>>
    %c0_i32_3 = arith.constant 0 : i32
    %10 = arith.addi %0, %c0_i32_3 : i32
    %c4_i32_4 = arith.constant 4 : i32
    %11 = arith.muli %10, %c4_i32_4 : i32
    %12 = arith.addi %11, %2 : i32
    %c9_i32_5 = arith.constant 9 : i32
    %13 = arith.muli %12, %c9_i32_5 : i32
    %c1_i32 = arith.constant 1 : i32
    %14 = arith.addi %13, %c1_i32 : i32
    %15 = arith.index_cast %14 : i32 to index
    %16 = memref.load %arg4[%15] : memref<72xf32, #tpu.memory_space<smem>>
    %c0_i32_6 = arith.constant 0 : i32
    %17 = arith.addi %0, %c0_i32_6 : i32
    %c4_i32_7 = arith.constant 4 : i32
    %18 = arith.muli %17, %c4_i32_7 : i32
    %19 = arith.addi %18, %2 : i32
    %c9_i32_8 = arith.constant 9 : i32
    %20 = arith.muli %19, %c9_i32_8 : i32
    %c2_i32_9 = arith.constant 2 : i32
    %21 = arith.addi %20, %c2_i32_9 : i32
    %22 = arith.index_cast %21 : i32 to index
    %23 = memref.load %arg4[%22] : memref<72xf32, #tpu.memory_space<smem>>
    %c0_i32_10 = arith.constant 0 : i32
    %24 = arith.addi %0, %c0_i32_10 : i32
    %c4_i32_11 = arith.constant 4 : i32
    %25 = arith.muli %24, %c4_i32_11 : i32
    %26 = arith.addi %25, %2 : i32
    %c9_i32_12 = arith.constant 9 : i32
    %27 = arith.muli %26, %c9_i32_12 : i32
    %c3_i32 = arith.constant 3 : i32
    %28 = arith.addi %27, %c3_i32 : i32
    %29 = arith.index_cast %28 : i32 to index
    %30 = memref.load %arg4[%29] : memref<72xf32, #tpu.memory_space<smem>>
    %c0_i32_13 = arith.constant 0 : i32
    %31 = arith.addi %0, %c0_i32_13 : i32
    %c4_i32_14 = arith.constant 4 : i32
    %32 = arith.muli %31, %c4_i32_14 : i32
    %33 = arith.addi %32, %2 : i32
    %c9_i32_15 = arith.constant 9 : i32
    %34 = arith.muli %33, %c9_i32_15 : i32
    %c4_i32_16 = arith.constant 4 : i32
    %35 = arith.addi %34, %c4_i32_16 : i32
    %36 = arith.index_cast %35 : i32 to index
    %37 = memref.load %arg4[%36] : memref<72xf32, #tpu.memory_space<smem>>
    %c0_i32_17 = arith.constant 0 : i32
    %38 = arith.addi %0, %c0_i32_17 : i32
    %c4_i32_18 = arith.constant 4 : i32
    %39 = arith.muli %38, %c4_i32_18 : i32
    %40 = arith.addi %39, %2 : i32
    %c9_i32_19 = arith.constant 9 : i32
    %41 = arith.muli %40, %c9_i32_19 : i32
    %c5_i32 = arith.constant 5 : i32
    %42 = arith.addi %41, %c5_i32 : i32
    %43 = arith.index_cast %42 : i32 to index
    %44 = memref.load %arg4[%43] : memref<72xf32, #tpu.memory_space<smem>>
    %c0_i32_20 = arith.constant 0 : i32
    %45 = arith.addi %0, %c0_i32_20 : i32
    %c4_i32_21 = arith.constant 4 : i32
    %46 = arith.muli %45, %c4_i32_21 : i32
    %47 = arith.addi %46, %2 : i32
    %c9_i32_22 = arith.constant 9 : i32
    %48 = arith.muli %47, %c9_i32_22 : i32
    %c6_i32 = arith.constant 6 : i32
    %49 = arith.addi %48, %c6_i32 : i32
    %50 = arith.index_cast %49 : i32 to index
    %51 = memref.load %arg4[%50] : memref<72xf32, #tpu.memory_space<smem>>
    %c0_i32_23 = arith.constant 0 : i32
    %52 = arith.addi %0, %c0_i32_23 : i32
    %c4_i32_24 = arith.constant 4 : i32
    %53 = arith.muli %52, %c4_i32_24 : i32
    %54 = arith.addi %53, %2 : i32
    %c9_i32_25 = arith.constant 9 : i32
    %55 = arith.muli %54, %c9_i32_25 : i32
    %c7_i32 = arith.constant 7 : i32
    %56 = arith.addi %55, %c7_i32 : i32
    %57 = arith.index_cast %56 : i32 to index
    %58 = memref.load %arg4[%57] : memref<72xf32, #tpu.memory_space<smem>>
    %c0_i32_26 = arith.constant 0 : i32
    %59 = arith.addi %0, %c0_i32_26 : i32
    %c4_i32_27 = arith.constant 4 : i32
    %60 = arith.muli %59, %c4_i32_27 : i32
    %61 = arith.addi %60, %2 : i32
    %c9_i32_28 = arith.constant 9 : i32
    %62 = arith.muli %61, %c9_i32_28 : i32
    %c8_i32 = arith.constant 8 : i32
    %63 = arith.addi %62, %c8_i32 : i32
    %64 = arith.index_cast %63 : i32 to index
    %65 = memref.load %arg4[%64] : memref<72xf32, #tpu.memory_space<smem>>
    %c1_i32_29 = arith.constant 1 : i32
    %66 = arith.addi %0, %c1_i32_29 : i32
    %c4_i32_30 = arith.constant 4 : i32
    %67 = arith.muli %66, %c4_i32_30 : i32
    %68 = arith.addi %67, %2 : i32
    %c9_i32_31 = arith.constant 9 : i32
    %69 = arith.muli %68, %c9_i32_31 : i32
    %c0_i32_32 = arith.constant 0 : i32
    %70 = arith.addi %69, %c0_i32_32 : i32
    %71 = arith.index_cast %70 : i32 to index
    %72 = memref.load %arg4[%71] : memref<72xf32, #tpu.memory_space<smem>>
    %c1_i32_33 = arith.constant 1 : i32
    %73 = arith.addi %0, %c1_i32_33 : i32
    %c4_i32_34 = arith.constant 4 : i32
    %74 = arith.muli %73, %c4_i32_34 : i32
    %75 = arith.addi %74, %2 : i32
    %c9_i32_35 = arith.constant 9 : i32
    %76 = arith.muli %75, %c9_i32_35 : i32
    %c1_i32_36 = arith.constant 1 : i32
    %77 = arith.addi %76, %c1_i32_36 : i32
    %78 = arith.index_cast %77 : i32 to index
    %79 = memref.load %arg4[%78] : memref<72xf32, #tpu.memory_space<smem>>
    %c1_i32_37 = arith.constant 1 : i32
    %80 = arith.addi %0, %c1_i32_37 : i32
    %c4_i32_38 = arith.constant 4 : i32
    %81 = arith.muli %80, %c4_i32_38 : i32
    %82 = arith.addi %81, %2 : i32
    %c9_i32_39 = arith.constant 9 : i32
    %83 = arith.muli %82, %c9_i32_39 : i32
    %c2_i32_40 = arith.constant 2 : i32
    %84 = arith.addi %83, %c2_i32_40 : i32
    %85 = arith.index_cast %84 : i32 to index
    %86 = memref.load %arg4[%85] : memref<72xf32, #tpu.memory_space<smem>>
    %c1_i32_41 = arith.constant 1 : i32
    %87 = arith.addi %0, %c1_i32_41 : i32
    %c4_i32_42 = arith.constant 4 : i32
    %88 = arith.muli %87, %c4_i32_42 : i32
    %89 = arith.addi %88, %2 : i32
    %c9_i32_43 = arith.constant 9 : i32
    %90 = arith.muli %89, %c9_i32_43 : i32
    %c3_i32_44 = arith.constant 3 : i32
    %91 = arith.addi %90, %c3_i32_44 : i32
    %92 = arith.index_cast %91 : i32 to index
    %93 = memref.load %arg4[%92] : memref<72xf32, #tpu.memory_space<smem>>
    %c1_i32_45 = arith.constant 1 : i32
    %94 = arith.addi %0, %c1_i32_45 : i32
    %c4_i32_46 = arith.constant 4 : i32
    %95 = arith.muli %94, %c4_i32_46 : i32
    %96 = arith.addi %95, %2 : i32
    %c9_i32_47 = arith.constant 9 : i32
    %97 = arith.muli %96, %c9_i32_47 : i32
    %c4_i32_48 = arith.constant 4 : i32
    %98 = arith.addi %97, %c4_i32_48 : i32
    %99 = arith.index_cast %98 : i32 to index
    %100 = memref.load %arg4[%99] : memref<72xf32, #tpu.memory_space<smem>>
    %c1_i32_49 = arith.constant 1 : i32
    %101 = arith.addi %0, %c1_i32_49 : i32
    %c4_i32_50 = arith.constant 4 : i32
    %102 = arith.muli %101, %c4_i32_50 : i32
    %103 = arith.addi %102, %2 : i32
    %c9_i32_51 = arith.constant 9 : i32
    %104 = arith.muli %103, %c9_i32_51 : i32
    %c5_i32_52 = arith.constant 5 : i32
    %105 = arith.addi %104, %c5_i32_52 : i32
    %106 = arith.index_cast %105 : i32 to index
    %107 = memref.load %arg4[%106] : memref<72xf32, #tpu.memory_space<smem>>
    %c1_i32_53 = arith.constant 1 : i32
    %108 = arith.addi %0, %c1_i32_53 : i32
    %c4_i32_54 = arith.constant 4 : i32
    %109 = arith.muli %108, %c4_i32_54 : i32
    %110 = arith.addi %109, %2 : i32
    %c9_i32_55 = arith.constant 9 : i32
    %111 = arith.muli %110, %c9_i32_55 : i32
    %c6_i32_56 = arith.constant 6 : i32
    %112 = arith.addi %111, %c6_i32_56 : i32
    %113 = arith.index_cast %112 : i32 to index
    %114 = memref.load %arg4[%113] : memref<72xf32, #tpu.memory_space<smem>>
    %c1_i32_57 = arith.constant 1 : i32
    %115 = arith.addi %0, %c1_i32_57 : i32
    %c4_i32_58 = arith.constant 4 : i32
    %116 = arith.muli %115, %c4_i32_58 : i32
    %117 = arith.addi %116, %2 : i32
    %c9_i32_59 = arith.constant 9 : i32
    %118 = arith.muli %117, %c9_i32_59 : i32
    %c7_i32_60 = arith.constant 7 : i32
    %119 = arith.addi %118, %c7_i32_60 : i32
    %120 = arith.index_cast %119 : i32 to index
    %121 = memref.load %arg4[%120] : memref<72xf32, #tpu.memory_space<smem>>
    %c1_i32_61 = arith.constant 1 : i32
    %122 = arith.addi %0, %c1_i32_61 : i32
    %c4_i32_62 = arith.constant 4 : i32
    %123 = arith.muli %122, %c4_i32_62 : i32
    %124 = arith.addi %123, %2 : i32
    %c9_i32_63 = arith.constant 9 : i32
    %125 = arith.muli %124, %c9_i32_63 : i32
    %c8_i32_64 = arith.constant 8 : i32
    %126 = arith.addi %125, %c8_i32_64 : i32
    %127 = arith.index_cast %126 : i32 to index
    %128 = memref.load %arg4[%127] : memref<72xf32, #tpu.memory_space<smem>>
    %cst = arith.constant 0.000000e+00 : f32
    %129 = vector.broadcast %cst : f32 to vector<16x16xf32>
    %c0 = arith.constant 0 : index
    %c0_65 = arith.constant 0 : index
    %c0_66 = arith.constant 0 : index
    %c0_67 = arith.constant 0 : index
    %c0_68 = arith.constant 0 : index
    %130 = vector.load %arg3[%c0, %c0_65, %c0_66, %c0_67, %c0_68] : memref<1x2x4x18x18xf32, #tpu.memory_space<vmem>>, vector<1x1x1x16x18xf32>
    %131 = vector.shape_cast %130 : vector<1x1x1x16x18xf32> to vector<16x18xf32>
    %132 = vector.extract_strided_slice %131 {offsets = [0, 0], sizes = [16, 16], strides = [1, 1]} : vector<16x18xf32> to vector<16x16xf32>
    %133 = vector.broadcast %9 : f32 to vector<16x16xf32>
    %134 = arith.mulf %132, %133 : vector<16x16xf32>
    %135 = arith.addf %129, %134 : vector<16x16xf32>
    %136 = vector.extract_strided_slice %131 {offsets = [0, 1], sizes = [16, 16], strides = [1, 1]} : vector<16x18xf32> to vector<16x16xf32>
    %137 = vector.broadcast %16 : f32 to vector<16x16xf32>
    %138 = arith.mulf %136, %137 : vector<16x16xf32>
    %139 = arith.addf %135, %138 : vector<16x16xf32>
    %140 = vector.extract_strided_slice %131 {offsets = [0, 2], sizes = [16, 16], strides = [1, 1]} : vector<16x18xf32> to vector<16x16xf32>
    %141 = vector.broadcast %23 : f32 to vector<16x16xf32>
    %142 = arith.mulf %140, %141 : vector<16x16xf32>
    %143 = arith.addf %139, %142 : vector<16x16xf32>
    %c0_69 = arith.constant 0 : index
    %c0_70 = arith.constant 0 : index
    %c0_71 = arith.constant 0 : index
    %c1 = arith.constant 1 : index
    %c0_72 = arith.constant 0 : index
    %144 = vector.load %arg3[%c0_69, %c0_70, %c0_71, %c1, %c0_72] : memref<1x2x4x18x18xf32, #tpu.memory_space<vmem>>, vector<1x1x1x16x18xf32>
    %145 = vector.shape_cast %144 : vector<1x1x1x16x18xf32> to vector<16x18xf32>
    %146 = vector.extract_strided_slice %145 {offsets = [0, 0], sizes = [16, 16], strides = [1, 1]} : vector<16x18xf32> to vector<16x16xf32>
    %147 = vector.broadcast %30 : f32 to vector<16x16xf32>
    %148 = arith.mulf %146, %147 : vector<16x16xf32>
    %149 = arith.addf %143, %148 : vector<16x16xf32>
    %150 = vector.extract_strided_slice %145 {offsets = [0, 1], sizes = [16, 16], strides = [1, 1]} : vector<16x18xf32> to vector<16x16xf32>
    %151 = vector.broadcast %37 : f32 to vector<16x16xf32>
    %152 = arith.mulf %150, %151 : vector<16x16xf32>
    %153 = arith.addf %149, %152 : vector<16x16xf32>
    %154 = vector.extract_strided_slice %145 {offsets = [0, 2], sizes = [16, 16], strides = [1, 1]} : vector<16x18xf32> to vector<16x16xf32>
    %155 = vector.broadcast %44 : f32 to vector<16x16xf32>
    %156 = arith.mulf %154, %155 : vector<16x16xf32>
    %157 = arith.addf %153, %156 : vector<16x16xf32>
    %c0_73 = arith.constant 0 : index
    %c0_74 = arith.constant 0 : index
    %c0_75 = arith.constant 0 : index
    %c2 = arith.constant 2 : index
    %c0_76 = arith.constant 0 : index
    %158 = vector.load %arg3[%c0_73, %c0_74, %c0_75, %c2, %c0_76] : memref<1x2x4x18x18xf32, #tpu.memory_space<vmem>>, vector<1x1x1x16x18xf32>
    %159 = vector.shape_cast %158 : vector<1x1x1x16x18xf32> to vector<16x18xf32>
    %160 = vector.extract_strided_slice %159 {offsets = [0, 0], sizes = [16, 16], strides = [1, 1]} : vector<16x18xf32> to vector<16x16xf32>
    %161 = vector.broadcast %51 : f32 to vector<16x16xf32>
    %162 = arith.mulf %160, %161 : vector<16x16xf32>
    %163 = arith.addf %157, %162 : vector<16x16xf32>
    %164 = vector.extract_strided_slice %159 {offsets = [0, 1], sizes = [16, 16], strides = [1, 1]} : vector<16x18xf32> to vector<16x16xf32>
    %165 = vector.broadcast %58 : f32 to vector<16x16xf32>
    %166 = arith.mulf %164, %165 : vector<16x16xf32>
    %167 = arith.addf %163, %166 : vector<16x16xf32>
    %168 = vector.extract_strided_slice %159 {offsets = [0, 2], sizes = [16, 16], strides = [1, 1]} : vector<16x18xf32> to vector<16x16xf32>
    %169 = vector.broadcast %65 : f32 to vector<16x16xf32>
    %170 = arith.mulf %168, %169 : vector<16x16xf32>
    %171 = arith.addf %167, %170 : vector<16x16xf32>
    %c0_77 = arith.constant 0 : index
    %c1_78 = arith.constant 1 : index
    %c0_79 = arith.constant 0 : index
    %c0_80 = arith.constant 0 : index
    %c0_81 = arith.constant 0 : index
    %172 = vector.load %arg3[%c0_77, %c1_78, %c0_79, %c0_80, %c0_81] : memref<1x2x4x18x18xf32, #tpu.memory_space<vmem>>, vector<1x1x1x16x18xf32>
    %173 = vector.shape_cast %172 : vector<1x1x1x16x18xf32> to vector<16x18xf32>
    %174 = vector.extract_strided_slice %173 {offsets = [0, 0], sizes = [16, 16], strides = [1, 1]} : vector<16x18xf32> to vector<16x16xf32>
    %175 = vector.broadcast %72 : f32 to vector<16x16xf32>
    %176 = arith.mulf %174, %175 : vector<16x16xf32>
    %177 = arith.addf %171, %176 : vector<16x16xf32>
    %178 = vector.extract_strided_slice %173 {offsets = [0, 1], sizes = [16, 16], strides = [1, 1]} : vector<16x18xf32> to vector<16x16xf32>
    %179 = vector.broadcast %79 : f32 to vector<16x16xf32>
    %180 = arith.mulf %178, %179 : vector<16x16xf32>
    %181 = arith.addf %177, %180 : vector<16x16xf32>
    %182 = vector.extract_strided_slice %173 {offsets = [0, 2], sizes = [16, 16], strides = [1, 1]} : vector<16x18xf32> to vector<16x16xf32>
    %183 = vector.broadcast %86 : f32 to vector<16x16xf32>
    %184 = arith.mulf %182, %183 : vector<16x16xf32>
    %185 = arith.addf %181, %184 : vector<16x16xf32>
    %c0_82 = arith.constant 0 : index
    %c1_83 = arith.constant 1 : index
    %c0_84 = arith.constant 0 : index
    %c1_85 = arith.constant 1 : index
    %c0_86 = arith.constant 0 : index
    %186 = vector.load %arg3[%c0_82, %c1_83, %c0_84, %c1_85, %c0_86] : memref<1x2x4x18x18xf32, #tpu.memory_space<vmem>>, vector<1x1x1x16x18xf32>
    %187 = vector.shape_cast %186 : vector<1x1x1x16x18xf32> to vector<16x18xf32>
    %188 = vector.extract_strided_slice %187 {offsets = [0, 0], sizes = [16, 16], strides = [1, 1]} : vector<16x18xf32> to vector<16x16xf32>
    %189 = vector.broadcast %93 : f32 to vector<16x16xf32>
    %190 = arith.mulf %188, %189 : vector<16x16xf32>
    %191 = arith.addf %185, %190 : vector<16x16xf32>
    %192 = vector.extract_strided_slice %187 {offsets = [0, 1], sizes = [16, 16], strides = [1, 1]} : vector<16x18xf32> to vector<16x16xf32>
    %193 = vector.broadcast %100 : f32 to vector<16x16xf32>
    %194 = arith.mulf %192, %193 : vector<16x16xf32>
    %195 = arith.addf %191, %194 : vector<16x16xf32>
    %196 = vector.extract_strided_slice %187 {offsets = [0, 2], sizes = [16, 16], strides = [1, 1]} : vector<16x18xf32> to vector<16x16xf32>
    %197 = vector.broadcast %107 : f32 to vector<16x16xf32>
    %198 = arith.mulf %196, %197 : vector<16x16xf32>
    %199 = arith.addf %195, %198 : vector<16x16xf32>
    %c0_87 = arith.constant 0 : index
    %c1_88 = arith.constant 1 : index
    %c0_89 = arith.constant 0 : index
    %c2_90 = arith.constant 2 : index
    %c0_91 = arith.constant 0 : index
    %200 = vector.load %arg3[%c0_87, %c1_88, %c0_89, %c2_90, %c0_91] : memref<1x2x4x18x18xf32, #tpu.memory_space<vmem>>, vector<1x1x1x16x18xf32>
    %201 = vector.shape_cast %200 : vector<1x1x1x16x18xf32> to vector<16x18xf32>
    %202 = vector.extract_strided_slice %201 {offsets = [0, 0], sizes = [16, 16], strides = [1, 1]} : vector<16x18xf32> to vector<16x16xf32>
    %203 = vector.broadcast %114 : f32 to vector<16x16xf32>
    %204 = arith.mulf %202, %203 : vector<16x16xf32>
    %205 = arith.addf %199, %204 : vector<16x16xf32>
    %206 = vector.extract_strided_slice %201 {offsets = [0, 1], sizes = [16, 16], strides = [1, 1]} : vector<16x18xf32> to vector<16x16xf32>
    %207 = vector.broadcast %121 : f32 to vector<16x16xf32>
    %208 = arith.mulf %206, %207 : vector<16x16xf32>
    %209 = arith.addf %205, %208 : vector<16x16xf32>
    %210 = vector.extract_strided_slice %201 {offsets = [0, 2], sizes = [16, 16], strides = [1, 1]} : vector<16x18xf32> to vector<16x16xf32>
    %211 = vector.broadcast %128 : f32 to vector<16x16xf32>
    %212 = arith.mulf %210, %211 : vector<16x16xf32>
    %213 = arith.addf %209, %212 : vector<16x16xf32>
    %c0_92 = arith.constant 0 : index
    %c0_93 = arith.constant 0 : index
    %c0_94 = arith.constant 0 : index
    %c0_95 = arith.constant 0 : index
    %214 = vector.load %arg5[%c0_92, %c0_93, %c0_94, %c0_95] : memref<1x4x16x16xf32, #tpu.memory_space<vmem>>, vector<1x1x16x16xf32>
    %215 = vector.shape_cast %214 : vector<1x1x16x16xf32> to vector<16x16xf32>
    %216 = vector.shape_cast %213 : vector<16x16xf32> to vector<1x1x16x16xf32>
    tpu.vector_store %arg5[%c0_92, %c0_93, %c0_94, %c0_95], %216 {strides = array<i32>} : memref<1x4x16x16xf32, #tpu.memory_space<vmem>>, vector<1x1x16x16xf32>,
    %c4_i32_96 = arith.constant 4 : i32
    %217 = arith.muli %arg1, %c4_i32_96 : i32
    %c1_i32_97 = arith.constant 1 : i32
    %218 = arith.addi %217, %c1_i32_97 : i32
    %c0_i32_98 = arith.constant 0 : i32
    %219 = arith.addi %0, %c0_i32_98 : i32
    %c4_i32_99 = arith.constant 4 : i32
    %220 = arith.muli %219, %c4_i32_99 : i32
    %221 = arith.addi %220, %218 : i32
    %c9_i32_100 = arith.constant 9 : i32
    %222 = arith.muli %221, %c9_i32_100 : i32
    %c0_i32_101 = arith.constant 0 : i32
    %223 = arith.addi %222, %c0_i32_101 : i32
    %224 = arith.index_cast %223 : i32 to index
    %225 = memref.load %arg4[%224] : memref<72xf32, #tpu.memory_space<smem>>
    %c0_i32_102 = arith.constant 0 : i32
    %226 = arith.addi %0, %c0_i32_102 : i32
    %c4_i32_103 = arith.constant 4 : i32
    %227 = arith.muli %226, %c4_i32_103 : i32
    %228 = arith.addi %227, %218 : i32
    %c9_i32_104 = arith.constant 9 : i32
    %229 = arith.muli %228, %c9_i32_104 : i32
    %c1_i32_105 = arith.constant 1 : i32
    %230 = arith.addi %229, %c1_i32_105 : i32
    %231 = arith.index_cast %230 : i32 to index
    %232 = memref.load %arg4[%231] : memref<72xf32, #tpu.memory_space<smem>>
    %c0_i32_106 = arith.constant 0 : i32
    %233 = arith.addi %0, %c0_i32_106 : i32
    %c4_i32_107 = arith.constant 4 : i32
    %234 = arith.muli %233, %c4_i32_107 : i32
    %235 = arith.addi %234, %218 : i32
    %c9_i32_108 = arith.constant 9 : i32
    %236 = arith.muli %235, %c9_i32_108 : i32
    %c2_i32_109 = arith.constant 2 : i32
    %237 = arith.addi %236, %c2_i32_109 : i32
    %238 = arith.index_cast %237 : i32 to index
    %239 = memref.load %arg4[%238] : memref<72xf32, #tpu.memory_space<smem>>
    %c0_i32_110 = arith.constant 0 : i32
    %240 = arith.addi %0, %c0_i32_110 : i32
    %c4_i32_111 = arith.constant 4 : i32
    %241 = arith.muli %240, %c4_i32_111 : i32
    %242 = arith.addi %241, %218 : i32
    %c9_i32_112 = arith.constant 9 : i32
    %243 = arith.muli %242, %c9_i32_112 : i32
    %c3_i32_113 = arith.constant 3 : i32
    %244 = arith.addi %243, %c3_i32_113 : i32
    %245 = arith.index_cast %244 : i32 to index
    %246 = memref.load %arg4[%245] : memref<72xf32, #tpu.memory_space<smem>>
    %c0_i32_114 = arith.constant 0 : i32
    %247 = arith.addi %0, %c0_i32_114 : i32
    %c4_i32_115 = arith.constant 4 : i32
    %248 = arith.muli %247, %c4_i32_115 : i32
    %249 = arith.addi %248, %218 : i32
    %c9_i32_116 = arith.constant 9 : i32
    %250 = arith.muli %249, %c9_i32_116 : i32
    %c4_i32_117 = arith.constant 4 : i32
    %251 = arith.addi %250, %c4_i32_117 : i32
    %252 = arith.index_cast %251 : i32 to index
    %253 = memref.load %arg4[%252] : memref<72xf32, #tpu.memory_space<smem>>
    %c0_i32_118 = arith.constant 0 : i32
    %254 = arith.addi %0, %c0_i32_118 : i32
    %c4_i32_119 = arith.constant 4 : i32
    %255 = arith.muli %254, %c4_i32_119 : i32
    %256 = arith.addi %255, %218 : i32
    %c9_i32_120 = arith.constant 9 : i32
    %257 = arith.muli %256, %c9_i32_120 : i32
    %c5_i32_121 = arith.constant 5 : i32
    %258 = arith.addi %257, %c5_i32_121 : i32
    %259 = arith.index_cast %258 : i32 to index
    %260 = memref.load %arg4[%259] : memref<72xf32, #tpu.memory_space<smem>>
    %c0_i32_122 = arith.constant 0 : i32
    %261 = arith.addi %0, %c0_i32_122 : i32
    %c4_i32_123 = arith.constant 4 : i32
    %262 = arith.muli %261, %c4_i32_123 : i32
    %263 = arith.addi %262, %218 : i32
    %c9_i32_124 = arith.constant 9 : i32
    %264 = arith.muli %263, %c9_i32_124 : i32
    %c6_i32_125 = arith.constant 6 : i32
    %265 = arith.addi %264, %c6_i32_125 : i32
    %266 = arith.index_cast %265 : i32 to index
    %267 = memref.load %arg4[%266] : memref<72xf32, #tpu.memory_space<smem>>
    %c0_i32_126 = arith.constant 0 : i32
    %268 = arith.addi %0, %c0_i32_126 : i32
    %c4_i32_127 = arith.constant 4 : i32
    %269 = arith.muli %268, %c4_i32_127 : i32
    %270 = arith.addi %269, %218 : i32
    %c9_i32_128 = arith.constant 9 : i32
    %271 = arith.muli %270, %c9_i32_128 : i32
    %c7_i32_129 = arith.constant 7 : i32
    %272 = arith.addi %271, %c7_i32_129 : i32
    %273 = arith.index_cast %272 : i32 to index
    %274 = memref.load %arg4[%273] : memref<72xf32, #tpu.memory_space<smem>>
    %c0_i32_130 = arith.constant 0 : i32
    %275 = arith.addi %0, %c0_i32_130 : i32
    %c4_i32_131 = arith.constant 4 : i32
    %276 = arith.muli %275, %c4_i32_131 : i32
    %277 = arith.addi %276, %218 : i32
    %c9_i32_132 = arith.constant 9 : i32
    %278 = arith.muli %277, %c9_i32_132 : i32
    %c8_i32_133 = arith.constant 8 : i32
    %279 = arith.addi %278, %c8_i32_133 : i32
    %280 = arith.index_cast %279 : i32 to index
    %281 = memref.load %arg4[%280] : memref<72xf32, #tpu.memory_space<smem>>
    %c1_i32_134 = arith.constant 1 : i32
    %282 = arith.addi %0, %c1_i32_134 : i32
    %c4_i32_135 = arith.constant 4 : i32
    %283 = arith.muli %282, %c4_i32_135 : i32
    %284 = arith.addi %283, %218 : i32
    %c9_i32_136 = arith.constant 9 : i32
    %285 = arith.muli %284, %c9_i32_136 : i32
    %c0_i32_137 = arith.constant 0 : i32
    %286 = arith.addi %285, %c0_i32_137 : i32
    %287 = arith.index_cast %286 : i32 to index
    %288 = memref.load %arg4[%287] : memref<72xf32, #tpu.memory_space<smem>>
    %c1_i32_138 = arith.constant 1 : i32
    %289 = arith.addi %0, %c1_i32_138 : i32
    %c4_i32_139 = arith.constant 4 : i32
    %290 = arith.muli %289, %c4_i32_139 : i32
    %291 = arith.addi %290, %218 : i32
    %c9_i32_140 = arith.constant 9 : i32
    %292 = arith.muli %291, %c9_i32_140 : i32
    %c1_i32_141 = arith.constant 1 : i32
    %293 = arith.addi %292, %c1_i32_141 : i32
    %294 = arith.index_cast %293 : i32 to index
    %295 = memref.load %arg4[%294] : memref<72xf32, #tpu.memory_space<smem>>
    %c1_i32_142 = arith.constant 1 : i32
    %296 = arith.addi %0, %c1_i32_142 : i32
    %c4_i32_143 = arith.constant 4 : i32
    %297 = arith.muli %296, %c4_i32_143 : i32
    %298 = arith.addi %297, %218 : i32
    %c9_i32_144 = arith.constant 9 : i32
    %299 = arith.muli %298, %c9_i32_144 : i32
    %c2_i32_145 = arith.constant 2 : i32
    %300 = arith.addi %299, %c2_i32_145 : i32
    %301 = arith.index_cast %300 : i32 to index
    %302 = memref.load %arg4[%301] : memref<72xf32, #tpu.memory_space<smem>>
    %c1_i32_146 = arith.constant 1 : i32
    %303 = arith.addi %0, %c1_i32_146 : i32
    %c4_i32_147 = arith.constant 4 : i32
    %304 = arith.muli %303, %c4_i32_147 : i32
    %305 = arith.addi %304, %218 : i32
    %c9_i32_148 = arith.constant 9 : i32
    %306 = arith.muli %305, %c9_i32_148 : i32
    %c3_i32_149 = arith.constant 3 : i32
    %307 = arith.addi %306, %c3_i32_149 : i32
    %308 = arith.index_cast %307 : i32 to index
    %309 = memref.load %arg4[%308] : memref<72xf32, #tpu.memory_space<smem>>
    %c1_i32_150 = arith.constant 1 : i32
    %310 = arith.addi %0, %c1_i32_150 : i32
    %c4_i32_151 = arith.constant 4 : i32
    %311 = arith.muli %310, %c4_i32_151 : i32
    %312 = arith.addi %311, %218 : i32
    %c9_i32_152 = arith.constant 9 : i32
    %313 = arith.muli %312, %c9_i32_152 : i32
    %c4_i32_153 = arith.constant 4 : i32
    %314 = arith.addi %313, %c4_i32_153 : i32
    %315 = arith.index_cast %314 : i32 to index
    %316 = memref.load %arg4[%315] : memref<72xf32, #tpu.memory_space<smem>>
    %c1_i32_154 = arith.constant 1 : i32
    %317 = arith.addi %0, %c1_i32_154 : i32
    %c4_i32_155 = arith.constant 4 : i32
    %318 = arith.muli %317, %c4_i32_155 : i32
    %319 = arith.addi %318, %218 : i32
    %c9_i32_156 = arith.constant 9 : i32
    %320 = arith.muli %319, %c9_i32_156 : i32
    %c5_i32_157 = arith.constant 5 : i32
    %321 = arith.addi %320, %c5_i32_157 : i32
    %322 = arith.index_cast %321 : i32 to index
    %323 = memref.load %arg4[%322] : memref<72xf32, #tpu.memory_space<smem>>
    %c1_i32_158 = arith.constant 1 : i32
    %324 = arith.addi %0, %c1_i32_158 : i32
    %c4_i32_159 = arith.constant 4 : i32
    %325 = arith.muli %324, %c4_i32_159 : i32
    %326 = arith.addi %325, %218 : i32
    %c9_i32_160 = arith.constant 9 : i32
    %327 = arith.muli %326, %c9_i32_160 : i32
    %c6_i32_161 = arith.constant 6 : i32
    %328 = arith.addi %327, %c6_i32_161 : i32
    %329 = arith.index_cast %328 : i32 to index
    %330 = memref.load %arg4[%329] : memref<72xf32, #tpu.memory_space<smem>>
    %c1_i32_162 = arith.constant 1 : i32
    %331 = arith.addi %0, %c1_i32_162 : i32
    %c4_i32_163 = arith.constant 4 : i32
    %332 = arith.muli %331, %c4_i32_163 : i32
    %333 = arith.addi %332, %218 : i32
    %c9_i32_164 = arith.constant 9 : i32
    %334 = arith.muli %333, %c9_i32_164 : i32
    %c7_i32_165 = arith.constant 7 : i32
    %335 = arith.addi %334, %c7_i32_165 : i32
    %336 = arith.index_cast %335 : i32 to index
    %337 = memref.load %arg4[%336] : memref<72xf32, #tpu.memory_space<smem>>
    %c1_i32_166 = arith.constant 1 : i32
    %338 = arith.addi %0, %c1_i32_166 : i32
    %c4_i32_167 = arith.constant 4 : i32
    %339 = arith.muli %338, %c4_i32_167 : i32
    %340 = arith.addi %339, %218 : i32
    %c9_i32_168 = arith.constant 9 : i32
    %341 = arith.muli %340, %c9_i32_168 : i32
    %c8_i32_169 = arith.constant 8 : i32
    %342 = arith.addi %341, %c8_i32_169 : i32
    %343 = arith.index_cast %342 : i32 to index
    %344 = memref.load %arg4[%343] : memref<72xf32, #tpu.memory_space<smem>>
    %cst_170 = arith.constant 0.000000e+00 : f32
    %345 = vector.broadcast %cst_170 : f32 to vector<16x16xf32>
    %c0_171 = arith.constant 0 : index
    %c0_172 = arith.constant 0 : index
    %c1_173 = arith.constant 1 : index
    %c0_174 = arith.constant 0 : index
    %c0_175 = arith.constant 0 : index
    %346 = vector.load %arg3[%c0_171, %c0_172, %c1_173, %c0_174, %c0_175] : memref<1x2x4x18x18xf32, #tpu.memory_space<vmem>>, vector<1x1x1x16x18xf32>
    %347 = vector.shape_cast %346 : vector<1x1x1x16x18xf32> to vector<16x18xf32>
    %348 = vector.extract_strided_slice %347 {offsets = [0, 0], sizes = [16, 16], strides = [1, 1]} : vector<16x18xf32> to vector<16x16xf32>
    %349 = vector.broadcast %225 : f32 to vector<16x16xf32>
    %350 = arith.mulf %348, %349 : vector<16x16xf32>
    %351 = arith.addf %345, %350 : vector<16x16xf32>
    %352 = vector.extract_strided_slice %347 {offsets = [0, 1], sizes = [16, 16], strides = [1, 1]} : vector<16x18xf32> to vector<16x16xf32>
    %353 = vector.broadcast %232 : f32 to vector<16x16xf32>
    %354 = arith.mulf %352, %353 : vector<16x16xf32>
    %355 = arith.addf %351, %354 : vector<16x16xf32>
    %356 = vector.extract_strided_slice %347 {offsets = [0, 2], sizes = [16, 16], strides = [1, 1]} : vector<16x18xf32> to vector<16x16xf32>
    %357 = vector.broadcast %239 : f32 to vector<16x16xf32>
    %358 = arith.mulf %356, %357 : vector<16x16xf32>
    %359 = arith.addf %355, %358 : vector<16x16xf32>
    %c0_176 = arith.constant 0 : index
    %c0_177 = arith.constant 0 : index
    %c1_178 = arith.constant 1 : index
    %c1_179 = arith.constant 1 : index
    %c0_180 = arith.constant 0 : index
    %360 = vector.load %arg3[%c0_176, %c0_177, %c1_178, %c1_179, %c0_180] : memref<1x2x4x18x18xf32, #tpu.memory_space<vmem>>, vector<1x1x1x16x18xf32>
    %361 = vector.shape_cast %360 : vector<1x1x1x16x18xf32> to vector<16x18xf32>
    %362 = vector.extract_strided_slice %361 {offsets = [0, 0], sizes = [16, 16], strides = [1, 1]} : vector<16x18xf32> to vector<16x16xf32>
    %363 = vector.broadcast %246 : f32 to vector<16x16xf32>
    %364 = arith.mulf %362, %363 : vector<16x16xf32>
    %365 = arith.addf %359, %364 : vector<16x16xf32>
    %366 = vector.extract_strided_slice %361 {offsets = [0, 1], sizes = [16, 16], strides = [1, 1]} : vector<16x18xf32> to vector<16x16xf32>
    %367 = vector.broadcast %253 : f32 to vector<16x16xf32>
    %368 = arith.mulf %366, %367 : vector<16x16xf32>
    %369 = arith.addf %365, %368 : vector<16x16xf32>
    %370 = vector.extract_strided_slice %361 {offsets = [0, 2], sizes = [16, 16], strides = [1, 1]} : vector<16x18xf32> to vector<16x16xf32>
    %371 = vector.broadcast %260 : f32 to vector<16x16xf32>
    %372 = arith.mulf %370, %371 : vector<16x16xf32>
    %373 = arith.addf %369, %372 : vector<16x16xf32>
    %c0_181 = arith.constant 0 : index
    %c0_182 = arith.constant 0 : index
    %c1_183 = arith.constant 1 : index
    %c2_184 = arith.constant 2 : index
    %c0_185 = arith.constant 0 : index
    %374 = vector.load %arg3[%c0_181, %c0_182, %c1_183, %c2_184, %c0_185] : memref<1x2x4x18x18xf32, #tpu.memory_space<vmem>>, vector<1x1x1x16x18xf32>
    %375 = vector.shape_cast %374 : vector<1x1x1x16x18xf32> to vector<16x18xf32>
    %376 = vector.extract_strided_slice %375 {offsets = [0, 0], sizes = [16, 16], strides = [1, 1]} : vector<16x18xf32> to vector<16x16xf32>
    %377 = vector.broadcast %267 : f32 to vector<16x16xf32>
    %378 = arith.mulf %376, %377 : vector<16x16xf32>
    %379 = arith.addf %373, %378 : vector<16x16xf32>
    %380 = vector.extract_strided_slice %375 {offsets = [0, 1], sizes = [16, 16], strides = [1, 1]} : vector<16x18xf32> to vector<16x16xf32>
    %381 = vector.broadcast %274 : f32 to vector<16x16xf32>
    %382 = arith.mulf %380, %381 : vector<16x16xf32>
    %383 = arith.addf %379, %382 : vector<16x16xf32>
    %384 = vector.extract_strided_slice %375 {offsets = [0, 2], sizes = [16, 16], strides = [1, 1]} : vector<16x18xf32> to vector<16x16xf32>
    %385 = vector.broadcast %281 : f32 to vector<16x16xf32>
    %386 = arith.mulf %384, %385 : vector<16x16xf32>
    %387 = arith.addf %383, %386 : vector<16x16xf32>
    %c0_186 = arith.constant 0 : index
    %c1_187 = arith.constant 1 : index
    %c1_188 = arith.constant 1 : index
    %c0_189 = arith.constant 0 : index
    %c0_190 = arith.constant 0 : index
    %388 = vector.load %arg3[%c0_186, %c1_187, %c1_188, %c0_189, %c0_190] : memref<1x2x4x18x18xf32, #tpu.memory_space<vmem>>, vector<1x1x1x16x18xf32>
    %389 = vector.shape_cast %388 : vector<1x1x1x16x18xf32> to vector<16x18xf32>
    %390 = vector.extract_strided_slice %389 {offsets = [0, 0], sizes = [16, 16], strides = [1, 1]} : vector<16x18xf32> to vector<16x16xf32>
    %391 = vector.broadcast %288 : f32 to vector<16x16xf32>
    %392 = arith.mulf %390, %391 : vector<16x16xf32>
    %393 = arith.addf %387, %392 : vector<16x16xf32>
    %394 = vector.extract_strided_slice %389 {offsets = [0, 1], sizes = [16, 16], strides = [1, 1]} : vector<16x18xf32> to vector<16x16xf32>
    %395 = vector.broadcast %295 : f32 to vector<16x16xf32>
    %396 = arith.mulf %394, %395 : vector<16x16xf32>
    %397 = arith.addf %393, %396 : vector<16x16xf32>
    %398 = vector.extract_strided_slice %389 {offsets = [0, 2], sizes = [16, 16], strides = [1, 1]} : vector<16x18xf32> to vector<16x16xf32>
    %399 = vector.broadcast %302 : f32 to vector<16x16xf32>
    %400 = arith.mulf %398, %399 : vector<16x16xf32>
    %401 = arith.addf %397, %400 : vector<16x16xf32>
    %c0_191 = arith.constant 0 : index
    %c1_192 = arith.constant 1 : index
    %c1_193 = arith.constant 1 : index
    %c1_194 = arith.constant 1 : index
    %c0_195 = arith.constant 0 : index
    %402 = vector.load %arg3[%c0_191, %c1_192, %c1_193, %c1_194, %c0_195] : memref<1x2x4x18x18xf32, #tpu.memory_space<vmem>>, vector<1x1x1x16x18xf32>
    %403 = vector.shape_cast %402 : vector<1x1x1x16x18xf32> to vector<16x18xf32>
    %404 = vector.extract_strided_slice %403 {offsets = [0, 0], sizes = [16, 16], strides = [1, 1]} : vector<16x18xf32> to vector<16x16xf32>
    %405 = vector.broadcast %309 : f32 to vector<16x16xf32>
    %406 = arith.mulf %404, %405 : vector<16x16xf32>
    %407 = arith.addf %401, %406 : vector<16x16xf32>
    %408 = vector.extract_strided_slice %403 {offsets = [0, 1], sizes = [16, 16], strides = [1, 1]} : vector<16x18xf32> to vector<16x16xf32>
    %409 = vector.broadcast %316 : f32 to vector<16x16xf32>
    %410 = arith.mulf %408, %409 : vector<16x16xf32>
    %411 = arith.addf %407, %410 : vector<16x16xf32>
    %412 = vector.extract_strided_slice %403 {offsets = [0, 2], sizes = [16, 16], strides = [1, 1]} : vector<16x18xf32> to vector<16x16xf32>
    %413 = vector.broadcast %323 : f32 to vector<16x16xf32>
    %414 = arith.mulf %412, %413 : vector<16x16xf32>
    %415 = arith.addf %411, %414 : vector<16x16xf32>
    %c0_196 = arith.constant 0 : index
    %c1_197 = arith.constant 1 : index
    %c1_198 = arith.constant 1 : index
    %c2_199 = arith.constant 2 : index
    %c0_200 = arith.constant 0 : index
    %416 = vector.load %arg3[%c0_196, %c1_197, %c1_198, %c2_199, %c0_200] : memref<1x2x4x18x18xf32, #tpu.memory_space<vmem>>, vector<1x1x1x16x18xf32>
    %417 = vector.shape_cast %416 : vector<1x1x1x16x18xf32> to vector<16x18xf32>
    %418 = vector.extract_strided_slice %417 {offsets = [0, 0], sizes = [16, 16], strides = [1, 1]} : vector<16x18xf32> to vector<16x16xf32>
    %419 = vector.broadcast %330 : f32 to vector<16x16xf32>
    %420 = arith.mulf %418, %419 : vector<16x16xf32>
    %421 = arith.addf %415, %420 : vector<16x16xf32>
    %422 = vector.extract_strided_slice %417 {offsets = [0, 1], sizes = [16, 16], strides = [1, 1]} : vector<16x18xf32> to vector<16x16xf32>
    %423 = vector.broadcast %337 : f32 to vector<16x16xf32>
    %424 = arith.mulf %422, %423 : vector<16x16xf32>
    %425 = arith.addf %421, %424 : vector<16x16xf32>
    %426 = vector.extract_strided_slice %417 {offsets = [0, 2], sizes = [16, 16], strides = [1, 1]} : vector<16x18xf32> to vector<16x16xf32>
    %427 = vector.broadcast %344 : f32 to vector<16x16xf32>
    %428 = arith.mulf %426, %427 : vector<16x16xf32>
    %429 = arith.addf %425, %428 : vector<16x16xf32>
    %c0_201 = arith.constant 0 : index
    %c1_202 = arith.constant 1 : index
    %c0_203 = arith.constant 0 : index
    %c0_204 = arith.constant 0 : index
    %430 = vector.load %arg5[%c0_201, %c1_202, %c0_203, %c0_204] : memref<1x4x16x16xf32, #tpu.memory_space<vmem>>, vector<1x1x16x16xf32>
    %431 = vector.shape_cast %430 : vector<1x1x16x16xf32> to vector<16x16xf32>
    %432 = vector.shape_cast %429 : vector<16x16xf32> to vector<1x1x16x16xf32>
    tpu.vector_store %arg5[%c0_201, %c1_202, %c0_203, %c0_204], %432 {strides = array<i32>} : memref<1x4x16x16xf32, #tpu.memory_space<vmem>>, vector<1x1x16x16xf32>,
    %c4_i32_205 = arith.constant 4 : i32
    %433 = arith.muli %arg1, %c4_i32_205 : i32
    %c2_i32_206 = arith.constant 2 : i32
    %434 = arith.addi %433, %c2_i32_206 : i32
    %c0_i32_207 = arith.constant 0 : i32
    %435 = arith.addi %0, %c0_i32_207 : i32
    %c4_i32_208 = arith.constant 4 : i32
    %436 = arith.muli %435, %c4_i32_208 : i32
    %437 = arith.addi %436, %434 : i32
    %c9_i32_209 = arith.constant 9 : i32
    %438 = arith.muli %437, %c9_i32_209 : i32
    %c0_i32_210 = arith.constant 0 : i32
    %439 = arith.addi %438, %c0_i32_210 : i32
    %440 = arith.index_cast %439 : i32 to index
    %441 = memref.load %arg4[%440] : memref<72xf32, #tpu.memory_space<smem>>
    %c0_i32_211 = arith.constant 0 : i32
    %442 = arith.addi %0, %c0_i32_211 : i32
    %c4_i32_212 = arith.constant 4 : i32
    %443 = arith.muli %442, %c4_i32_212 : i32
    %444 = arith.addi %443, %434 : i32
    %c9_i32_213 = arith.constant 9 : i32
    %445 = arith.muli %444, %c9_i32_213 : i32
    %c1_i32_214 = arith.constant 1 : i32
    %446 = arith.addi %445, %c1_i32_214 : i32
    %447 = arith.index_cast %446 : i32 to index
    %448 = memref.load %arg4[%447] : memref<72xf32, #tpu.memory_space<smem>>
    %c0_i32_215 = arith.constant 0 : i32
    %449 = arith.addi %0, %c0_i32_215 : i32
    %c4_i32_216 = arith.constant 4 : i32
    %450 = arith.muli %449, %c4_i32_216 : i32
    %451 = arith.addi %450, %434 : i32
    %c9_i32_217 = arith.constant 9 : i32
    %452 = arith.muli %451, %c9_i32_217 : i32
    %c2_i32_218 = arith.constant 2 : i32
    %453 = arith.addi %452, %c2_i32_218 : i32
    %454 = arith.index_cast %453 : i32 to index
    %455 = memref.load %arg4[%454] : memref<72xf32, #tpu.memory_space<smem>>
    %c0_i32_219 = arith.constant 0 : i32
    %456 = arith.addi %0, %c0_i32_219 : i32
    %c4_i32_220 = arith.constant 4 : i32
    %457 = arith.muli %456, %c4_i32_220 : i32
    %458 = arith.addi %457, %434 : i32
    %c9_i32_221 = arith.constant 9 : i32
    %459 = arith.muli %458, %c9_i32_221 : i32
    %c3_i32_222 = arith.constant 3 : i32
    %460 = arith.addi %459, %c3_i32_222 : i32
    %461 = arith.index_cast %460 : i32 to index
    %462 = memref.load %arg4[%461] : memref<72xf32, #tpu.memory_space<smem>>
    %c0_i32_223 = arith.constant 0 : i32
    %463 = arith.addi %0, %c0_i32_223 : i32
    %c4_i32_224 = arith.constant 4 : i32
    %464 = arith.muli %463, %c4_i32_224 : i32
    %465 = arith.addi %464, %434 : i32
    %c9_i32_225 = arith.constant 9 : i32
    %466 = arith.muli %465, %c9_i32_225 : i32
    %c4_i32_226 = arith.constant 4 : i32
    %467 = arith.addi %466, %c4_i32_226 : i32
    %468 = arith.index_cast %467 : i32 to index
    %469 = memref.load %arg4[%468] : memref<72xf32, #tpu.memory_space<smem>>
    %c0_i32_227 = arith.constant 0 : i32
    %470 = arith.addi %0, %c0_i32_227 : i32
    %c4_i32_228 = arith.constant 4 : i32
    %471 = arith.muli %470, %c4_i32_228 : i32
    %472 = arith.addi %471, %434 : i32
    %c9_i32_229 = arith.constant 9 : i32
    %473 = arith.muli %472, %c9_i32_229 : i32
    %c5_i32_230 = arith.constant 5 : i32
    %474 = arith.addi %473, %c5_i32_230 : i32
    %475 = arith.index_cast %474 : i32 to index
    %476 = memref.load %arg4[%475] : memref<72xf32, #tpu.memory_space<smem>>
    %c0_i32_231 = arith.constant 0 : i32
    %477 = arith.addi %0, %c0_i32_231 : i32
    %c4_i32_232 = arith.constant 4 : i32
    %478 = arith.muli %477, %c4_i32_232 : i32
    %479 = arith.addi %478, %434 : i32
    %c9_i32_233 = arith.constant 9 : i32
    %480 = arith.muli %479, %c9_i32_233 : i32
    %c6_i32_234 = arith.constant 6 : i32
    %481 = arith.addi %480, %c6_i32_234 : i32
    %482 = arith.index_cast %481 : i32 to index
    %483 = memref.load %arg4[%482] : memref<72xf32, #tpu.memory_space<smem>>
    %c0_i32_235 = arith.constant 0 : i32
    %484 = arith.addi %0, %c0_i32_235 : i32
    %c4_i32_236 = arith.constant 4 : i32
    %485 = arith.muli %484, %c4_i32_236 : i32
    %486 = arith.addi %485, %434 : i32
    %c9_i32_237 = arith.constant 9 : i32
    %487 = arith.muli %486, %c9_i32_237 : i32
    %c7_i32_238 = arith.constant 7 : i32
    %488 = arith.addi %487, %c7_i32_238 : i32
    %489 = arith.index_cast %488 : i32 to index
    %490 = memref.load %arg4[%489] : memref<72xf32, #tpu.memory_space<smem>>
    %c0_i32_239 = arith.constant 0 : i32
    %491 = arith.addi %0, %c0_i32_239 : i32
    %c4_i32_240 = arith.constant 4 : i32
    %492 = arith.muli %491, %c4_i32_240 : i32
    %493 = arith.addi %492, %434 : i32
    %c9_i32_241 = arith.constant 9 : i32
    %494 = arith.muli %493, %c9_i32_241 : i32
    %c8_i32_242 = arith.constant 8 : i32
    %495 = arith.addi %494, %c8_i32_242 : i32
    %496 = arith.index_cast %495 : i32 to index
    %497 = memref.load %arg4[%496] : memref<72xf32, #tpu.memory_space<smem>>
    %c1_i32_243 = arith.constant 1 : i32
    %498 = arith.addi %0, %c1_i32_243 : i32
    %c4_i32_244 = arith.constant 4 : i32
    %499 = arith.muli %498, %c4_i32_244 : i32
    %500 = arith.addi %499, %434 : i32
    %c9_i32_245 = arith.constant 9 : i32
    %501 = arith.muli %500, %c9_i32_245 : i32
    %c0_i32_246 = arith.constant 0 : i32
    %502 = arith.addi %501, %c0_i32_246 : i32
    %503 = arith.index_cast %502 : i32 to index
    %504 = memref.load %arg4[%503] : memref<72xf32, #tpu.memory_space<smem>>
    %c1_i32_247 = arith.constant 1 : i32
    %505 = arith.addi %0, %c1_i32_247 : i32
    %c4_i32_248 = arith.constant 4 : i32
    %506 = arith.muli %505, %c4_i32_248 : i32
    %507 = arith.addi %506, %434 : i32
    %c9_i32_249 = arith.constant 9 : i32
    %508 = arith.muli %507, %c9_i32_249 : i32
    %c1_i32_250 = arith.constant 1 : i32
    %509 = arith.addi %508, %c1_i32_250 : i32
    %510 = arith.index_cast %509 : i32 to index
    %511 = memref.load %arg4[%510] : memref<72xf32, #tpu.memory_space<smem>>
    %c1_i32_251 = arith.constant 1 : i32
    %512 = arith.addi %0, %c1_i32_251 : i32
    %c4_i32_252 = arith.constant 4 : i32
    %513 = arith.muli %512, %c4_i32_252 : i32
    %514 = arith.addi %513, %434 : i32
    %c9_i32_253 = arith.constant 9 : i32
    %515 = arith.muli %514, %c9_i32_253 : i32
    %c2_i32_254 = arith.constant 2 : i32
    %516 = arith.addi %515, %c2_i32_254 : i32
    %517 = arith.index_cast %516 : i32 to index
    %518 = memref.load %arg4[%517] : memref<72xf32, #tpu.memory_space<smem>>
    %c1_i32_255 = arith.constant 1 : i32
    %519 = arith.addi %0, %c1_i32_255 : i32
    %c4_i32_256 = arith.constant 4 : i32
    %520 = arith.muli %519, %c4_i32_256 : i32
    %521 = arith.addi %520, %434 : i32
    %c9_i32_257 = arith.constant 9 : i32
    %522 = arith.muli %521, %c9_i32_257 : i32
    %c3_i32_258 = arith.constant 3 : i32
    %523 = arith.addi %522, %c3_i32_258 : i32
    %524 = arith.index_cast %523 : i32 to index
    %525 = memref.load %arg4[%524] : memref<72xf32, #tpu.memory_space<smem>>
    %c1_i32_259 = arith.constant 1 : i32
    %526 = arith.addi %0, %c1_i32_259 : i32
    %c4_i32_260 = arith.constant 4 : i32
    %527 = arith.muli %526, %c4_i32_260 : i32
    %528 = arith.addi %527, %434 : i32
    %c9_i32_261 = arith.constant 9 : i32
    %529 = arith.muli %528, %c9_i32_261 : i32
    %c4_i32_262 = arith.constant 4 : i32
    %530 = arith.addi %529, %c4_i32_262 : i32
    %531 = arith.index_cast %530 : i32 to index
    %532 = memref.load %arg4[%531] : memref<72xf32, #tpu.memory_space<smem>>
    %c1_i32_263 = arith.constant 1 : i32
    %533 = arith.addi %0, %c1_i32_263 : i32
    %c4_i32_264 = arith.constant 4 : i32
    %534 = arith.muli %533, %c4_i32_264 : i32
    %535 = arith.addi %534, %434 : i32
    %c9_i32_265 = arith.constant 9 : i32
    %536 = arith.muli %535, %c9_i32_265 : i32
    %c5_i32_266 = arith.constant 5 : i32
    %537 = arith.addi %536, %c5_i32_266 : i32
    %538 = arith.index_cast %537 : i32 to index
    %539 = memref.load %arg4[%538] : memref<72xf32, #tpu.memory_space<smem>>
    %c1_i32_267 = arith.constant 1 : i32
    %540 = arith.addi %0, %c1_i32_267 : i32
    %c4_i32_268 = arith.constant 4 : i32
    %541 = arith.muli %540, %c4_i32_268 : i32
    %542 = arith.addi %541, %434 : i32
    %c9_i32_269 = arith.constant 9 : i32
    %543 = arith.muli %542, %c9_i32_269 : i32
    %c6_i32_270 = arith.constant 6 : i32
    %544 = arith.addi %543, %c6_i32_270 : i32
    %545 = arith.index_cast %544 : i32 to index
    %546 = memref.load %arg4[%545] : memref<72xf32, #tpu.memory_space<smem>>
    %c1_i32_271 = arith.constant 1 : i32
    %547 = arith.addi %0, %c1_i32_271 : i32
    %c4_i32_272 = arith.constant 4 : i32
    %548 = arith.muli %547, %c4_i32_272 : i32
    %549 = arith.addi %548, %434 : i32
    %c9_i32_273 = arith.constant 9 : i32
    %550 = arith.muli %549, %c9_i32_273 : i32
    %c7_i32_274 = arith.constant 7 : i32
    %551 = arith.addi %550, %c7_i32_274 : i32
    %552 = arith.index_cast %551 : i32 to index
    %553 = memref.load %arg4[%552] : memref<72xf32, #tpu.memory_space<smem>>
    %c1_i32_275 = arith.constant 1 : i32
    %554 = arith.addi %0, %c1_i32_275 : i32
    %c4_i32_276 = arith.constant 4 : i32
    %555 = arith.muli %554, %c4_i32_276 : i32
    %556 = arith.addi %555, %434 : i32
    %c9_i32_277 = arith.constant 9 : i32
    %557 = arith.muli %556, %c9_i32_277 : i32
    %c8_i32_278 = arith.constant 8 : i32
    %558 = arith.addi %557, %c8_i32_278 : i32
    %559 = arith.index_cast %558 : i32 to index
    %560 = memref.load %arg4[%559] : memref<72xf32, #tpu.memory_space<smem>>
    %cst_279 = arith.constant 0.000000e+00 : f32
    %561 = vector.broadcast %cst_279 : f32 to vector<16x16xf32>
    %c0_280 = arith.constant 0 : index
    %c0_281 = arith.constant 0 : index
    %c2_282 = arith.constant 2 : index
    %c0_283 = arith.constant 0 : index
    %c0_284 = arith.constant 0 : index
    %562 = vector.load %arg3[%c0_280, %c0_281, %c2_282, %c0_283, %c0_284] : memref<1x2x4x18x18xf32, #tpu.memory_space<vmem>>, vector<1x1x1x16x18xf32>
    %563 = vector.shape_cast %562 : vector<1x1x1x16x18xf32> to vector<16x18xf32>
    %564 = vector.extract_strided_slice %563 {offsets = [0, 0], sizes = [16, 16], strides = [1, 1]} : vector<16x18xf32> to vector<16x16xf32>
    %565 = vector.broadcast %441 : f32 to vector<16x16xf32>
    %566 = arith.mulf %564, %565 : vector<16x16xf32>
    %567 = arith.addf %561, %566 : vector<16x16xf32>
    %568 = vector.extract_strided_slice %563 {offsets = [0, 1], sizes = [16, 16], strides = [1, 1]} : vector<16x18xf32> to vector<16x16xf32>
    %569 = vector.broadcast %448 : f32 to vector<16x16xf32>
    %570 = arith.mulf %568, %569 : vector<16x16xf32>
    %571 = arith.addf %567, %570 : vector<16x16xf32>
    %572 = vector.extract_strided_slice %563 {offsets = [0, 2], sizes = [16, 16], strides = [1, 1]} : vector<16x18xf32> to vector<16x16xf32>
    %573 = vector.broadcast %455 : f32 to vector<16x16xf32>
    %574 = arith.mulf %572, %573 : vector<16x16xf32>
    %575 = arith.addf %571, %574 : vector<16x16xf32>
    %c0_285 = arith.constant 0 : index
    %c0_286 = arith.constant 0 : index
    %c2_287 = arith.constant 2 : index
    %c1_288 = arith.constant 1 : index
    %c0_289 = arith.constant 0 : index
    %576 = vector.load %arg3[%c0_285, %c0_286, %c2_287, %c1_288, %c0_289] : memref<1x2x4x18x18xf32, #tpu.memory_space<vmem>>, vector<1x1x1x16x18xf32>
    %577 = vector.shape_cast %576 : vector<1x1x1x16x18xf32> to vector<16x18xf32>
    %578 = vector.extract_strided_slice %577 {offsets = [0, 0], sizes = [16, 16], strides = [1, 1]} : vector<16x18xf32> to vector<16x16xf32>
    %579 = vector.broadcast %462 : f32 to vector<16x16xf32>
    %580 = arith.mulf %578, %579 : vector<16x16xf32>
    %581 = arith.addf %575, %580 : vector<16x16xf32>
    %582 = vector.extract_strided_slice %577 {offsets = [0, 1], sizes = [16, 16], strides = [1, 1]} : vector<16x18xf32> to vector<16x16xf32>
    %583 = vector.broadcast %469 : f32 to vector<16x16xf32>
    %584 = arith.mulf %582, %583 : vector<16x16xf32>
    %585 = arith.addf %581, %584 : vector<16x16xf32>
    %586 = vector.extract_strided_slice %577 {offsets = [0, 2], sizes = [16, 16], strides = [1, 1]} : vector<16x18xf32> to vector<16x16xf32>
    %587 = vector.broadcast %476 : f32 to vector<16x16xf32>
    %588 = arith.mulf %586, %587 : vector<16x16xf32>
    %589 = arith.addf %585, %588 : vector<16x16xf32>
    %c0_290 = arith.constant 0 : index
    %c0_291 = arith.constant 0 : index
    %c2_292 = arith.constant 2 : index
    %c2_293 = arith.constant 2 : index
    %c0_294 = arith.constant 0 : index
    %590 = vector.load %arg3[%c0_290, %c0_291, %c2_292, %c2_293, %c0_294] : memref<1x2x4x18x18xf32, #tpu.memory_space<vmem>>, vector<1x1x1x16x18xf32>
    %591 = vector.shape_cast %590 : vector<1x1x1x16x18xf32> to vector<16x18xf32>
    %592 = vector.extract_strided_slice %591 {offsets = [0, 0], sizes = [16, 16], strides = [1, 1]} : vector<16x18xf32> to vector<16x16xf32>
    %593 = vector.broadcast %483 : f32 to vector<16x16xf32>
    %594 = arith.mulf %592, %593 : vector<16x16xf32>
    %595 = arith.addf %589, %594 : vector<16x16xf32>
    %596 = vector.extract_strided_slice %591 {offsets = [0, 1], sizes = [16, 16], strides = [1, 1]} : vector<16x18xf32> to vector<16x16xf32>
    %597 = vector.broadcast %490 : f32 to vector<16x16xf32>
    %598 = arith.mulf %596, %597 : vector<16x16xf32>
    %599 = arith.addf %595, %598 : vector<16x16xf32>
    %600 = vector.extract_strided_slice %591 {offsets = [0, 2], sizes = [16, 16], strides = [1, 1]} : vector<16x18xf32> to vector<16x16xf32>
    %601 = vector.broadcast %497 : f32 to vector<16x16xf32>
    %602 = arith.mulf %600, %601 : vector<16x16xf32>
    %603 = arith.addf %599, %602 : vector<16x16xf32>
    %c0_295 = arith.constant 0 : index
    %c1_296 = arith.constant 1 : index
    %c2_297 = arith.constant 2 : index
    %c0_298 = arith.constant 0 : index
    %c0_299 = arith.constant 0 : index
    %604 = vector.load %arg3[%c0_295, %c1_296, %c2_297, %c0_298, %c0_299] : memref<1x2x4x18x18xf32, #tpu.memory_space<vmem>>, vector<1x1x1x16x18xf32>
    %605 = vector.shape_cast %604 : vector<1x1x1x16x18xf32> to vector<16x18xf32>
    %606 = vector.extract_strided_slice %605 {offsets = [0, 0], sizes = [16, 16], strides = [1, 1]} : vector<16x18xf32> to vector<16x16xf32>
    %607 = vector.broadcast %504 : f32 to vector<16x16xf32>
    %608 = arith.mulf %606, %607 : vector<16x16xf32>
    %609 = arith.addf %603, %608 : vector<16x16xf32>
    %610 = vector.extract_strided_slice %605 {offsets = [0, 1], sizes = [16, 16], strides = [1, 1]} : vector<16x18xf32> to vector<16x16xf32>
    %611 = vector.broadcast %511 : f32 to vector<16x16xf32>
    %612 = arith.mulf %610, %611 : vector<16x16xf32>
    %613 = arith.addf %609, %612 : vector<16x16xf32>
    %614 = vector.extract_strided_slice %605 {offsets = [0, 2], sizes = [16, 16], strides = [1, 1]} : vector<16x18xf32> to vector<16x16xf32>
    %615 = vector.broadcast %518 : f32 to vector<16x16xf32>
    %616 = arith.mulf %614, %615 : vector<16x16xf32>
    %617 = arith.addf %613, %616 : vector<16x16xf32>
    %c0_300 = arith.constant 0 : index
    %c1_301 = arith.constant 1 : index
    %c2_302 = arith.constant 2 : index
    %c1_303 = arith.constant 1 : index
    %c0_304 = arith.constant 0 : index
    %618 = vector.load %arg3[%c0_300, %c1_301, %c2_302, %c1_303, %c0_304] : memref<1x2x4x18x18xf32, #tpu.memory_space<vmem>>, vector<1x1x1x16x18xf32>
    %619 = vector.shape_cast %618 : vector<1x1x1x16x18xf32> to vector<16x18xf32>
    %620 = vector.extract_strided_slice %619 {offsets = [0, 0], sizes = [16, 16], strides = [1, 1]} : vector<16x18xf32> to vector<16x16xf32>
    %621 = vector.broadcast %525 : f32 to vector<16x16xf32>
    %622 = arith.mulf %620, %621 : vector<16x16xf32>
    %623 = arith.addf %617, %622 : vector<16x16xf32>
    %624 = vector.extract_strided_slice %619 {offsets = [0, 1], sizes = [16, 16], strides = [1, 1]} : vector<16x18xf32> to vector<16x16xf32>
    %625 = vector.broadcast %532 : f32 to vector<16x16xf32>
    %626 = arith.mulf %624, %625 : vector<16x16xf32>
    %627 = arith.addf %623, %626 : vector<16x16xf32>
    %628 = vector.extract_strided_slice %619 {offsets = [0, 2], sizes = [16, 16], strides = [1, 1]} : vector<16x18xf32> to vector<16x16xf32>
    %629 = vector.broadcast %539 : f32 to vector<16x16xf32>
    %630 = arith.mulf %628, %629 : vector<16x16xf32>
    %631 = arith.addf %627, %630 : vector<16x16xf32>
    %c0_305 = arith.constant 0 : index
    %c1_306 = arith.constant 1 : index
    %c2_307 = arith.constant 2 : index
    %c2_308 = arith.constant 2 : index
    %c0_309 = arith.constant 0 : index
    %632 = vector.load %arg3[%c0_305, %c1_306, %c2_307, %c2_308, %c0_309] : memref<1x2x4x18x18xf32, #tpu.memory_space<vmem>>, vector<1x1x1x16x18xf32>
    %633 = vector.shape_cast %632 : vector<1x1x1x16x18xf32> to vector<16x18xf32>
    %634 = vector.extract_strided_slice %633 {offsets = [0, 0], sizes = [16, 16], strides = [1, 1]} : vector<16x18xf32> to vector<16x16xf32>
    %635 = vector.broadcast %546 : f32 to vector<16x16xf32>
    %636 = arith.mulf %634, %635 : vector<16x16xf32>
    %637 = arith.addf %631, %636 : vector<16x16xf32>
    %638 = vector.extract_strided_slice %633 {offsets = [0, 1], sizes = [16, 16], strides = [1, 1]} : vector<16x18xf32> to vector<16x16xf32>
    %639 = vector.broadcast %553 : f32 to vector<16x16xf32>
    %640 = arith.mulf %638, %639 : vector<16x16xf32>
    %641 = arith.addf %637, %640 : vector<16x16xf32>
    %642 = vector.extract_strided_slice %633 {offsets = [0, 2], sizes = [16, 16], strides = [1, 1]} : vector<16x18xf32> to vector<16x16xf32>
    %643 = vector.broadcast %560 : f32 to vector<16x16xf32>
    %644 = arith.mulf %642, %643 : vector<16x16xf32>
    %645 = arith.addf %641, %644 : vector<16x16xf32>
    %c0_310 = arith.constant 0 : index
    %c2_311 = arith.constant 2 : index
    %c0_312 = arith.constant 0 : index
    %c0_313 = arith.constant 0 : index
    %646 = vector.load %arg5[%c0_310, %c2_311, %c0_312, %c0_313] : memref<1x4x16x16xf32, #tpu.memory_space<vmem>>, vector<1x1x16x16xf32>
    %647 = vector.shape_cast %646 : vector<1x1x16x16xf32> to vector<16x16xf32>
    %648 = vector.shape_cast %645 : vector<16x16xf32> to vector<1x1x16x16xf32>
    tpu.vector_store %arg5[%c0_310, %c2_311, %c0_312, %c0_313], %648 {strides = array<i32>} : memref<1x4x16x16xf32, #tpu.memory_space<vmem>>, vector<1x1x16x16xf32>,
    %c4_i32_314 = arith.constant 4 : i32
    %649 = arith.muli %arg1, %c4_i32_314 : i32
    %c3_i32_315 = arith.constant 3 : i32
    %650 = arith.addi %649, %c3_i32_315 : i32
    %c0_i32_316 = arith.constant 0 : i32
    %651 = arith.addi %0, %c0_i32_316 : i32
    %c4_i32_317 = arith.constant 4 : i32
    %652 = arith.muli %651, %c4_i32_317 : i32
    %653 = arith.addi %652, %650 : i32
    %c9_i32_318 = arith.constant 9 : i32
    %654 = arith.muli %653, %c9_i32_318 : i32
    %c0_i32_319 = arith.constant 0 : i32
    %655 = arith.addi %654, %c0_i32_319 : i32
    %656 = arith.index_cast %655 : i32 to index
    %657 = memref.load %arg4[%656] : memref<72xf32, #tpu.memory_space<smem>>
    %c0_i32_320 = arith.constant 0 : i32
    %658 = arith.addi %0, %c0_i32_320 : i32
    %c4_i32_321 = arith.constant 4 : i32
    %659 = arith.muli %658, %c4_i32_321 : i32
    %660 = arith.addi %659, %650 : i32
    %c9_i32_322 = arith.constant 9 : i32
    %661 = arith.muli %660, %c9_i32_322 : i32
    %c1_i32_323 = arith.constant 1 : i32
    %662 = arith.addi %661, %c1_i32_323 : i32
    %663 = arith.index_cast %662 : i32 to index
    %664 = memref.load %arg4[%663] : memref<72xf32, #tpu.memory_space<smem>>
    %c0_i32_324 = arith.constant 0 : i32
    %665 = arith.addi %0, %c0_i32_324 : i32
    %c4_i32_325 = arith.constant 4 : i32
    %666 = arith.muli %665, %c4_i32_325 : i32
    %667 = arith.addi %666, %650 : i32
    %c9_i32_326 = arith.constant 9 : i32
    %668 = arith.muli %667, %c9_i32_326 : i32
    %c2_i32_327 = arith.constant 2 : i32
    %669 = arith.addi %668, %c2_i32_327 : i32
    %670 = arith.index_cast %669 : i32 to index
    %671 = memref.load %arg4[%670] : memref<72xf32, #tpu.memory_space<smem>>
    %c0_i32_328 = arith.constant 0 : i32
    %672 = arith.addi %0, %c0_i32_328 : i32
    %c4_i32_329 = arith.constant 4 : i32
    %673 = arith.muli %672, %c4_i32_329 : i32
    %674 = arith.addi %673, %650 : i32
    %c9_i32_330 = arith.constant 9 : i32
    %675 = arith.muli %674, %c9_i32_330 : i32
    %c3_i32_331 = arith.constant 3 : i32
    %676 = arith.addi %675, %c3_i32_331 : i32
    %677 = arith.index_cast %676 : i32 to index
    %678 = memref.load %arg4[%677] : memref<72xf32, #tpu.memory_space<smem>>
    %c0_i32_332 = arith.constant 0 : i32
    %679 = arith.addi %0, %c0_i32_332 : i32
    %c4_i32_333 = arith.constant 4 : i32
    %680 = arith.muli %679, %c4_i32_333 : i32
    %681 = arith.addi %680, %650 : i32
    %c9_i32_334 = arith.constant 9 : i32
    %682 = arith.muli %681, %c9_i32_334 : i32
    %c4_i32_335 = arith.constant 4 : i32
    %683 = arith.addi %682, %c4_i32_335 : i32
    %684 = arith.index_cast %683 : i32 to index
    %685 = memref.load %arg4[%684] : memref<72xf32, #tpu.memory_space<smem>>
    %c0_i32_336 = arith.constant 0 : i32
    %686 = arith.addi %0, %c0_i32_336 : i32
    %c4_i32_337 = arith.constant 4 : i32
    %687 = arith.muli %686, %c4_i32_337 : i32
    %688 = arith.addi %687, %650 : i32
    %c9_i32_338 = arith.constant 9 : i32
    %689 = arith.muli %688, %c9_i32_338 : i32
    %c5_i32_339 = arith.constant 5 : i32
    %690 = arith.addi %689, %c5_i32_339 : i32
    %691 = arith.index_cast %690 : i32 to index
    %692 = memref.load %arg4[%691] : memref<72xf32, #tpu.memory_space<smem>>
    %c0_i32_340 = arith.constant 0 : i32
    %693 = arith.addi %0, %c0_i32_340 : i32
    %c4_i32_341 = arith.constant 4 : i32
    %694 = arith.muli %693, %c4_i32_341 : i32
    %695 = arith.addi %694, %650 : i32
    %c9_i32_342 = arith.constant 9 : i32
    %696 = arith.muli %695, %c9_i32_342 : i32
    %c6_i32_343 = arith.constant 6 : i32
    %697 = arith.addi %696, %c6_i32_343 : i32
    %698 = arith.index_cast %697 : i32 to index
    %699 = memref.load %arg4[%698] : memref<72xf32, #tpu.memory_space<smem>>
    %c0_i32_344 = arith.constant 0 : i32
    %700 = arith.addi %0, %c0_i32_344 : i32
    %c4_i32_345 = arith.constant 4 : i32
    %701 = arith.muli %700, %c4_i32_345 : i32
    %702 = arith.addi %701, %650 : i32
    %c9_i32_346 = arith.constant 9 : i32
    %703 = arith.muli %702, %c9_i32_346 : i32
    %c7_i32_347 = arith.constant 7 : i32
    %704 = arith.addi %703, %c7_i32_347 : i32
    %705 = arith.index_cast %704 : i32 to index
    %706 = memref.load %arg4[%705] : memref<72xf32, #tpu.memory_space<smem>>
    %c0_i32_348 = arith.constant 0 : i32
    %707 = arith.addi %0, %c0_i32_348 : i32
    %c4_i32_349 = arith.constant 4 : i32
    %708 = arith.muli %707, %c4_i32_349 : i32
    %709 = arith.addi %708, %650 : i32
    %c9_i32_350 = arith.constant 9 : i32
    %710 = arith.muli %709, %c9_i32_350 : i32
    %c8_i32_351 = arith.constant 8 : i32
    %711 = arith.addi %710, %c8_i32_351 : i32
    %712 = arith.index_cast %711 : i32 to index
    %713 = memref.load %arg4[%712] : memref<72xf32, #tpu.memory_space<smem>>
    %c1_i32_352 = arith.constant 1 : i32
    %714 = arith.addi %0, %c1_i32_352 : i32
    %c4_i32_353 = arith.constant 4 : i32
    %715 = arith.muli %714, %c4_i32_353 : i32
    %716 = arith.addi %715, %650 : i32
    %c9_i32_354 = arith.constant 9 : i32
    %717 = arith.muli %716, %c9_i32_354 : i32
    %c0_i32_355 = arith.constant 0 : i32
    %718 = arith.addi %717, %c0_i32_355 : i32
    %719 = arith.index_cast %718 : i32 to index
    %720 = memref.load %arg4[%719] : memref<72xf32, #tpu.memory_space<smem>>
    %c1_i32_356 = arith.constant 1 : i32
    %721 = arith.addi %0, %c1_i32_356 : i32
    %c4_i32_357 = arith.constant 4 : i32
    %722 = arith.muli %721, %c4_i32_357 : i32
    %723 = arith.addi %722, %650 : i32
    %c9_i32_358 = arith.constant 9 : i32
    %724 = arith.muli %723, %c9_i32_358 : i32
    %c1_i32_359 = arith.constant 1 : i32
    %725 = arith.addi %724, %c1_i32_359 : i32
    %726 = arith.index_cast %725 : i32 to index
    %727 = memref.load %arg4[%726] : memref<72xf32, #tpu.memory_space<smem>>
    %c1_i32_360 = arith.constant 1 : i32
    %728 = arith.addi %0, %c1_i32_360 : i32
    %c4_i32_361 = arith.constant 4 : i32
    %729 = arith.muli %728, %c4_i32_361 : i32
    %730 = arith.addi %729, %650 : i32
    %c9_i32_362 = arith.constant 9 : i32
    %731 = arith.muli %730, %c9_i32_362 : i32
    %c2_i32_363 = arith.constant 2 : i32
    %732 = arith.addi %731, %c2_i32_363 : i32
    %733 = arith.index_cast %732 : i32 to index
    %734 = memref.load %arg4[%733] : memref<72xf32, #tpu.memory_space<smem>>
    %c1_i32_364 = arith.constant 1 : i32
    %735 = arith.addi %0, %c1_i32_364 : i32
    %c4_i32_365 = arith.constant 4 : i32
    %736 = arith.muli %735, %c4_i32_365 : i32
    %737 = arith.addi %736, %650 : i32
    %c9_i32_366 = arith.constant 9 : i32
    %738 = arith.muli %737, %c9_i32_366 : i32
    %c3_i32_367 = arith.constant 3 : i32
    %739 = arith.addi %738, %c3_i32_367 : i32
    %740 = arith.index_cast %739 : i32 to index
    %741 = memref.load %arg4[%740] : memref<72xf32, #tpu.memory_space<smem>>
    %c1_i32_368 = arith.constant 1 : i32
    %742 = arith.addi %0, %c1_i32_368 : i32
    %c4_i32_369 = arith.constant 4 : i32
    %743 = arith.muli %742, %c4_i32_369 : i32
    %744 = arith.addi %743, %650 : i32
    %c9_i32_370 = arith.constant 9 : i32
    %745 = arith.muli %744, %c9_i32_370 : i32
    %c4_i32_371 = arith.constant 4 : i32
    %746 = arith.addi %745, %c4_i32_371 : i32
    %747 = arith.index_cast %746 : i32 to index
    %748 = memref.load %arg4[%747] : memref<72xf32, #tpu.memory_space<smem>>
    %c1_i32_372 = arith.constant 1 : i32
    %749 = arith.addi %0, %c1_i32_372 : i32
    %c4_i32_373 = arith.constant 4 : i32
    %750 = arith.muli %749, %c4_i32_373 : i32
    %751 = arith.addi %750, %650 : i32
    %c9_i32_374 = arith.constant 9 : i32
    %752 = arith.muli %751, %c9_i32_374 : i32
    %c5_i32_375 = arith.constant 5 : i32
    %753 = arith.addi %752, %c5_i32_375 : i32
    %754 = arith.index_cast %753 : i32 to index
    %755 = memref.load %arg4[%754] : memref<72xf32, #tpu.memory_space<smem>>
    %c1_i32_376 = arith.constant 1 : i32
    %756 = arith.addi %0, %c1_i32_376 : i32
    %c4_i32_377 = arith.constant 4 : i32
    %757 = arith.muli %756, %c4_i32_377 : i32
    %758 = arith.addi %757, %650 : i32
    %c9_i32_378 = arith.constant 9 : i32
    %759 = arith.muli %758, %c9_i32_378 : i32
    %c6_i32_379 = arith.constant 6 : i32
    %760 = arith.addi %759, %c6_i32_379 : i32
    %761 = arith.index_cast %760 : i32 to index
    %762 = memref.load %arg4[%761] : memref<72xf32, #tpu.memory_space<smem>>
    %c1_i32_380 = arith.constant 1 : i32
    %763 = arith.addi %0, %c1_i32_380 : i32
    %c4_i32_381 = arith.constant 4 : i32
    %764 = arith.muli %763, %c4_i32_381 : i32
    %765 = arith.addi %764, %650 : i32
    %c9_i32_382 = arith.constant 9 : i32
    %766 = arith.muli %765, %c9_i32_382 : i32
    %c7_i32_383 = arith.constant 7 : i32
    %767 = arith.addi %766, %c7_i32_383 : i32
    %768 = arith.index_cast %767 : i32 to index
    %769 = memref.load %arg4[%768] : memref<72xf32, #tpu.memory_space<smem>>
    %c1_i32_384 = arith.constant 1 : i32
    %770 = arith.addi %0, %c1_i32_384 : i32
    %c4_i32_385 = arith.constant 4 : i32
    %771 = arith.muli %770, %c4_i32_385 : i32
    %772 = arith.addi %771, %650 : i32
    %c9_i32_386 = arith.constant 9 : i32
    %773 = arith.muli %772, %c9_i32_386 : i32
    %c8_i32_387 = arith.constant 8 : i32
    %774 = arith.addi %773, %c8_i32_387 : i32
    %775 = arith.index_cast %774 : i32 to index
    %776 = memref.load %arg4[%775] : memref<72xf32, #tpu.memory_space<smem>>
    %cst_388 = arith.constant 0.000000e+00 : f32
    %777 = vector.broadcast %cst_388 : f32 to vector<16x16xf32>
    %c0_389 = arith.constant 0 : index
    %c0_390 = arith.constant 0 : index
    %c3 = arith.constant 3 : index
    %c0_391 = arith.constant 0 : index
    %c0_392 = arith.constant 0 : index
    %778 = vector.load %arg3[%c0_389, %c0_390, %c3, %c0_391, %c0_392] : memref<1x2x4x18x18xf32, #tpu.memory_space<vmem>>, vector<1x1x1x16x18xf32>
    %779 = vector.shape_cast %778 : vector<1x1x1x16x18xf32> to vector<16x18xf32>
    %780 = vector.extract_strided_slice %779 {offsets = [0, 0], sizes = [16, 16], strides = [1, 1]} : vector<16x18xf32> to vector<16x16xf32>
    %781 = vector.broadcast %657 : f32 to vector<16x16xf32>
    %782 = arith.mulf %780, %781 : vector<16x16xf32>
    %783 = arith.addf %777, %782 : vector<16x16xf32>
    %784 = vector.extract_strided_slice %779 {offsets = [0, 1], sizes = [16, 16], strides = [1, 1]} : vector<16x18xf32> to vector<16x16xf32>
    %785 = vector.broadcast %664 : f32 to vector<16x16xf32>
    %786 = arith.mulf %784, %785 : vector<16x16xf32>
    %787 = arith.addf %783, %786 : vector<16x16xf32>
    %788 = vector.extract_strided_slice %779 {offsets = [0, 2], sizes = [16, 16], strides = [1, 1]} : vector<16x18xf32> to vector<16x16xf32>
    %789 = vector.broadcast %671 : f32 to vector<16x16xf32>
    %790 = arith.mulf %788, %789 : vector<16x16xf32>
    %791 = arith.addf %787, %790 : vector<16x16xf32>
    %c0_393 = arith.constant 0 : index
    %c0_394 = arith.constant 0 : index
    %c3_395 = arith.constant 3 : index
    %c1_396 = arith.constant 1 : index
    %c0_397 = arith.constant 0 : index
    %792 = vector.load %arg3[%c0_393, %c0_394, %c3_395, %c1_396, %c0_397] : memref<1x2x4x18x18xf32, #tpu.memory_space<vmem>>, vector<1x1x1x16x18xf32>
    %793 = vector.shape_cast %792 : vector<1x1x1x16x18xf32> to vector<16x18xf32>
    %794 = vector.extract_strided_slice %793 {offsets = [0, 0], sizes = [16, 16], strides = [1, 1]} : vector<16x18xf32> to vector<16x16xf32>
    %795 = vector.broadcast %678 : f32 to vector<16x16xf32>
    %796 = arith.mulf %794, %795 : vector<16x16xf32>
    %797 = arith.addf %791, %796 : vector<16x16xf32>
    %798 = vector.extract_strided_slice %793 {offsets = [0, 1], sizes = [16, 16], strides = [1, 1]} : vector<16x18xf32> to vector<16x16xf32>
    %799 = vector.broadcast %685 : f32 to vector<16x16xf32>
    %800 = arith.mulf %798, %799 : vector<16x16xf32>
    %801 = arith.addf %797, %800 : vector<16x16xf32>
    %802 = vector.extract_strided_slice %793 {offsets = [0, 2], sizes = [16, 16], strides = [1, 1]} : vector<16x18xf32> to vector<16x16xf32>
    %803 = vector.broadcast %692 : f32 to vector<16x16xf32>
    %804 = arith.mulf %802, %803 : vector<16x16xf32>
    %805 = arith.addf %801, %804 : vector<16x16xf32>
    %c0_398 = arith.constant 0 : index
    %c0_399 = arith.constant 0 : index
    %c3_400 = arith.constant 3 : index
    %c2_401 = arith.constant 2 : index
    %c0_402 = arith.constant 0 : index
    %806 = vector.load %arg3[%c0_398, %c0_399, %c3_400, %c2_401, %c0_402] : memref<1x2x4x18x18xf32, #tpu.memory_space<vmem>>, vector<1x1x1x16x18xf32>
    %807 = vector.shape_cast %806 : vector<1x1x1x16x18xf32> to vector<16x18xf32>
    %808 = vector.extract_strided_slice %807 {offsets = [0, 0], sizes = [16, 16], strides = [1, 1]} : vector<16x18xf32> to vector<16x16xf32>
    %809 = vector.broadcast %699 : f32 to vector<16x16xf32>
    %810 = arith.mulf %808, %809 : vector<16x16xf32>
    %811 = arith.addf %805, %810 : vector<16x16xf32>
    %812 = vector.extract_strided_slice %807 {offsets = [0, 1], sizes = [16, 16], strides = [1, 1]} : vector<16x18xf32> to vector<16x16xf32>
    %813 = vector.broadcast %706 : f32 to vector<16x16xf32>
    %814 = arith.mulf %812, %813 : vector<16x16xf32>
    %815 = arith.addf %811, %814 : vector<16x16xf32>
    %816 = vector.extract_strided_slice %807 {offsets = [0, 2], sizes = [16, 16], strides = [1, 1]} : vector<16x18xf32> to vector<16x16xf32>
    %817 = vector.broadcast %713 : f32 to vector<16x16xf32>
    %818 = arith.mulf %816, %817 : vector<16x16xf32>
    %819 = arith.addf %815, %818 : vector<16x16xf32>
    %c0_403 = arith.constant 0 : index
    %c1_404 = arith.constant 1 : index
    %c3_405 = arith.constant 3 : index
    %c0_406 = arith.constant 0 : index
    %c0_407 = arith.constant 0 : index
    %820 = vector.load %arg3[%c0_403, %c1_404, %c3_405, %c0_406, %c0_407] : memref<1x2x4x18x18xf32, #tpu.memory_space<vmem>>, vector<1x1x1x16x18xf32>
    %821 = vector.shape_cast %820 : vector<1x1x1x16x18xf32> to vector<16x18xf32>
    %822 = vector.extract_strided_slice %821 {offsets = [0, 0], sizes = [16, 16], strides = [1, 1]} : vector<16x18xf32> to vector<16x16xf32>
    %823 = vector.broadcast %720 : f32 to vector<16x16xf32>
    %824 = arith.mulf %822, %823 : vector<16x16xf32>
    %825 = arith.addf %819, %824 : vector<16x16xf32>
    %826 = vector.extract_strided_slice %821 {offsets = [0, 1], sizes = [16, 16], strides = [1, 1]} : vector<16x18xf32> to vector<16x16xf32>
    %827 = vector.broadcast %727 : f32 to vector<16x16xf32>
    %828 = arith.mulf %826, %827 : vector<16x16xf32>
    %829 = arith.addf %825, %828 : vector<16x16xf32>
    %830 = vector.extract_strided_slice %821 {offsets = [0, 2], sizes = [16, 16], strides = [1, 1]} : vector<16x18xf32> to vector<16x16xf32>
    %831 = vector.broadcast %734 : f32 to vector<16x16xf32>
    %832 = arith.mulf %830, %831 : vector<16x16xf32>
    %833 = arith.addf %829, %832 : vector<16x16xf32>
    %c0_408 = arith.constant 0 : index
    %c1_409 = arith.constant 1 : index
    %c3_410 = arith.constant 3 : index
    %c1_411 = arith.constant 1 : index
    %c0_412 = arith.constant 0 : index
    %834 = vector.load %arg3[%c0_408, %c1_409, %c3_410, %c1_411, %c0_412] : memref<1x2x4x18x18xf32, #tpu.memory_space<vmem>>, vector<1x1x1x16x18xf32>
    %835 = vector.shape_cast %834 : vector<1x1x1x16x18xf32> to vector<16x18xf32>
    %836 = vector.extract_strided_slice %835 {offsets = [0, 0], sizes = [16, 16], strides = [1, 1]} : vector<16x18xf32> to vector<16x16xf32>
    %837 = vector.broadcast %741 : f32 to vector<16x16xf32>
    %838 = arith.mulf %836, %837 : vector<16x16xf32>
    %839 = arith.addf %833, %838 : vector<16x16xf32>
    %840 = vector.extract_strided_slice %835 {offsets = [0, 1], sizes = [16, 16], strides = [1, 1]} : vector<16x18xf32> to vector<16x16xf32>
    %841 = vector.broadcast %748 : f32 to vector<16x16xf32>
    %842 = arith.mulf %840, %841 : vector<16x16xf32>
    %843 = arith.addf %839, %842 : vector<16x16xf32>
    %844 = vector.extract_strided_slice %835 {offsets = [0, 2], sizes = [16, 16], strides = [1, 1]} : vector<16x18xf32> to vector<16x16xf32>
    %845 = vector.broadcast %755 : f32 to vector<16x16xf32>
    %846 = arith.mulf %844, %845 : vector<16x16xf32>
    %847 = arith.addf %843, %846 : vector<16x16xf32>
    %c0_413 = arith.constant 0 : index
    %c1_414 = arith.constant 1 : index
    %c3_415 = arith.constant 3 : index
    %c2_416 = arith.constant 2 : index
    %c0_417 = arith.constant 0 : index
    %848 = vector.load %arg3[%c0_413, %c1_414, %c3_415, %c2_416, %c0_417] : memref<1x2x4x18x18xf32, #tpu.memory_space<vmem>>, vector<1x1x1x16x18xf32>
    %849 = vector.shape_cast %848 : vector<1x1x1x16x18xf32> to vector<16x18xf32>
    %850 = vector.extract_strided_slice %849 {offsets = [0, 0], sizes = [16, 16], strides = [1, 1]} : vector<16x18xf32> to vector<16x16xf32>
    %851 = vector.broadcast %762 : f32 to vector<16x16xf32>
    %852 = arith.mulf %850, %851 : vector<16x16xf32>
    %853 = arith.addf %847, %852 : vector<16x16xf32>
    %854 = vector.extract_strided_slice %849 {offsets = [0, 1], sizes = [16, 16], strides = [1, 1]} : vector<16x18xf32> to vector<16x16xf32>
    %855 = vector.broadcast %769 : f32 to vector<16x16xf32>
    %856 = arith.mulf %854, %855 : vector<16x16xf32>
    %857 = arith.addf %853, %856 : vector<16x16xf32>
    %858 = vector.extract_strided_slice %849 {offsets = [0, 2], sizes = [16, 16], strides = [1, 1]} : vector<16x18xf32> to vector<16x16xf32>
    %859 = vector.broadcast %776 : f32 to vector<16x16xf32>
    %860 = arith.mulf %858, %859 : vector<16x16xf32>
    %861 = arith.addf %857, %860 : vector<16x16xf32>
    %c0_418 = arith.constant 0 : index
    %c3_419 = arith.constant 3 : index
    %c0_420 = arith.constant 0 : index
    %c0_421 = arith.constant 0 : index
    %862 = vector.load %arg5[%c0_418, %c3_419, %c0_420, %c0_421] : memref<1x4x16x16xf32, #tpu.memory_space<vmem>>, vector<1x1x16x16xf32>
    %863 = vector.shape_cast %862 : vector<1x1x16x16xf32> to vector<16x16xf32>
    %864 = vector.shape_cast %861 : vector<16x16xf32> to vector<1x1x16x16xf32>
    tpu.vector_store %arg5[%c0_418, %c3_419, %c0_420, %c0_421], %864 {strides = array<i32>} : memref<1x4x16x16xf32, #tpu.memory_space<vmem>>, vector<1x1x16x16xf32>,
    return
  }
  func.func @transform_0(%arg0: i32, %arg1: i32, %arg2: i32) -> (i32, i32, i32, i32, i32) {
    %c0_i32 = arith.constant 0 : i32
    %c0_i32_0 = arith.constant 0 : i32
    %c0_i32_1 = arith.constant 0 : i32
    return %arg0, %arg2, %arg1, %c0_i32, %c0_i32_0 : i32, i32, i32, i32, i32
  }
  func.func @transform_1(%arg0: i32, %arg1: i32, %arg2: i32) -> i32 {
    %c0_i32 = arith.constant 0 : i32
    %c0_i32_0 = arith.constant 0 : i32
    return %c0_i32 : i32
  }
  func.func @transform_2(%arg0: i32, %arg1: i32, %arg2: i32) -> (i32, i32, i32, i32) {
    %c0_i32 = arith.constant 0 : i32
    %c0_i32_0 = arith.constant 0 : i32
    %c0_i32_1 = arith.constant 0 : i32
    return %arg0, %arg1, %c0_i32, %c0_i32_0 : i32, i32, i32, i32
  }
}

</mosaic_0001>

<bundles_post_ra>
// kernel: tpu_custom_call.1
= control target key start
LH: loop header
LB: loop body
LE: loop exit
PB: predicated region body
PF: predicated region fallthrough
CT: control target
= control target key end

     0   :  { %7 = vsyncpa [#allocation3], 0  ;;  %s2419_s0 = inlined_call_operand.hbm [shape: f32[2,2,4,18,18], index: 0, kind: input, shape index: {}]   ;;  %s2420_s1 = inlined_call_operand.hbm [shape: f32[72], index: 1, kind: input, shape index: {}]   ;;  %s2421_s2 = inlined_call_operand.hbm [shape: f32[2,4,16,16], index: 2, kind: output, shape index: {}]  }
   0x1   :  { %9 = vsyncpa [#allocation3 + $0x1], 0 }
   0x2   :  { %10 = vsyncpa [#allocation5], 0 }
   0x3   :  { %11 = vsyncpa [#allocation4], 0 }
   0x4   :  { %13 = vsyncpa [#allocation4 + $0x1], 0  ;;  %s1671_s9 = smov 0   ;;  %s1673_s10 = smov 0  }
   0x5   :  { %s1675_s11 = smov 0   ;;  %s1677_s12 = smov 0  }
   0x6   :  { %s1679_s13 = smov 0   ;;  %s1681_s14 = smov 0  }
   0x7 LB: > { %s1300_s15 = sadd.s32 4294967295, %s1645_s14   ;;  %s1301_s16 = sadd.s32 4294967294, %s1645_s14   ;;  %s1645_s14 = sphi %s1681_s14, %s19_s14   ;;  %s1641_s13 = sphi %s1679_s13, %s2441_s13   ;;  %s1637_s12 = sphi %s1677_s12, %s2440_s12   ;;  %s1633_s11 = sphi %s1675_s11, %s2439_s11   ;;  %s1629_s10 = sphi %s1673_s10, %s2438_s10   ;;  %s1625_s9 = sphi %s1671_s9, %s2437_s9  }
   0x8   : > { %s49_s17 = sadd.s32 1, %s1633_s11  ;;  %p56_p0 = scmp.ne.s32.totalorder %s1633_s11, %s1629_s10 }
   0x9   : > { %p57_p1 = scmp.eq.s32.totalorder %s1645_s14, 0  ;;  %p62_p2 = scmp.ne.s32.totalorder %s1629_s10, %s1625_s9 }
   0xa   : > { %p1709_p3 = scmp.eq.s32.totalorder %s1300_s15, 0  ;;  %p109_p4 = scmp.eq.s32.totalorder %s1300_s15, 1 }
   0xb   : > { %p58_p5 = por %p57_p1, %p56_p0  ;;  %p115_p6 = scmp.eq.s32.totalorder %s1301_s16, 1 }
   0xc   : > { %s2426_s18 = scalar_select %p1709_p3, 1, 0 }
   0xd   : > { %p1715_p7 = por %p1709_p3, %p62_p2  ;;  %p1719_p8 = por %p109_p4, %p56_p0 }
   0xe   : > { %p1723_p9 = por %p115_p6, %p62_p2  ;;  %p1302_p10 = scmp.ge.s32.totalorder %s1645_s14, 1 }
   0xf   : > { %s2427_s19 = scalar_select %p1715_p7, 1, 0 }
  0x10   : > { %s2428_s20 = scalar_select %p1719_p8, 1, 0 }
  0x11   : > { %s2429_s21 = scalar_select %p1723_p9, 1, 0 }
  0x12   : > { %p122_p11 = scmp.lt.s32.totalorder %s1645_s14, 3  ;;  %p1458_p1 = scmp.lt.s32.totalorder %s1645_s14, 2 }
  0x13   : > { %s144_s23 = sand.u32 1, %s1633_s11   ;;  %s38_s25 = sadd.s32 1, %s1641_s13 }
  0x14   : > { %p1730_p13 = pnand %p1302_p10, %p122_p11  ;;  %p1738_p0 = pnand %p1458_p1, %p58_p5 }
  0x15   : > { %s1434_s26 = smul.u32 192, %s144_s23  ;;  %p40_p4 = scmp.ge.s32.totalorder %s38_s25, 2 }
  0x16   : > { %p1445_p7 = pneg %p1730_p13  ;;  %s1516_s29 = scalar_lea.hbm %s2420_s1, 16 }
  0x17   : > { %p1517_p6 = scmp.ne.s32.totalorder %s2420_s1, %s1516_s29  ;;  %p1523_p5 = scmp.lt.u32.totalorder %s1516_s29, %s2420_s1 }
  0x18   : > { %p1446_p2 = pnand %p1445_p7, %p1709_p3 }
  0x1a   : > { %p1518_p10 = pneg %p1446_p2 }
  0x1c   : > { %p1519_p11 = pnand %p1518_p10, %p1517_p6 }
  0x1e   : > { %p1520_p12 = pneg %p1519_p11 }
  0x20   : > { %p1525_p1 = pnand %p1523_p5, %p1520_p12 }
  0x22   : > { %1528 = shalt.err (!%p1525_p1)
}
  0x23   : > { %s1647_s6 = smov [#allocation6]   ;;  %s2443_s25 = smov (%p40_p4, %s38_s25), 0 }
  0x24   : > { %1448 = dma.hbm_to_smem (!%p1446_p2), %s2420_s1, 16, %s1647_s6, [#allocation5]  }
  0x25   : > { %s1435_s15 = smul.u32 3072, %s1641_s13  ;;  %s42_s16 = ssub.s32 %s1641_s13, %s2443_s25 }
  0x26   : > { %s148_s27 = scalar_lea.vmem [#allocation2], %s1434_s26  ;;  %p47_p7 = scmp.eq.s32.totalorder %s42_s16, 0 }
  0x27   : > { %s161_s28 = sshll.u32 %s148_s27, 4  ;;  %s1765_s3 = scalar_lea.hbm %s2419_s0, %s1435_s15  ;;  %s1767_s28 = int_to_ptr.vmem [resolvable:$true] %s161_s28 }
  0x28   : > { %s1772_s4 = scalar_select %p47_p7, %s1633_s11, %s49_s17  }
  0x29   : > { %s1774_s5 = scalar_lea.sflag [#allocation3], %s144_s23  ;;  %s1529_s6 = scalar_lea.hbm %s1765_s3, 3072 }
  0x2a   : > { %p1530_p12 = scmp.ne.s32.totalorder %s1765_s3, %s1529_s6  ;;  %p1531_p2 = pneg %p1738_p0 }
  0x2b   : > { %s1534_s8 = scalar_lea.hbm %s2419_s0, 6144  ;;  %p1535_p10 = scmp.lt.u32.totalorder %s1765_s3, %s2419_s0 }
  0x2c   : > { %p1532_p4 = pnand %p1531_p2, %p1530_p12  ;;  %p1536_p11 = scmp.lt.u32.totalorder %s1534_s8, %s1529_s6 }
  0x2d   : > { %p1538_p1 = scmp.lt.u32.totalorder %s1529_s6, %s1765_s3 }
  0x2e   : > { %p1533_p6 = pneg %p1532_p4  ;;  %p1537_p5 = por %p1536_p11, %p1535_p10 }
  0x30   : > { %p1539_p7 = por %p1538_p1, %p1537_p5 }
  0x32   : > { %p1540_p9 = pnand %p1539_p7, %p1533_p6 }
  0x34   : > { %1543 = shalt.err (!%p1540_p9)
}
  0x35   : > { %s1544_s17 = scalar_lea.vmem %s1767_s28, 3072  ;;  %s1648_s23 = smov [#allocation2]  }
  0x36   : > { %p1545_p12 = scmp.ne.s32.totalorder %s1767_s28, %s1544_s17  ;;  %s1549_s27 = sshll.u32 %s1648_s23, 4  ;;  %s1550_s27 = int_to_ptr.vmem [resolvable:$false] %s1549_s27 }
  0x37   : > { %s1551_s29 = scalar_lea.vmem %s1550_s27, 6144  ;;  %p1552_p3 = scmp.lt.s32.totalorder %s1767_s28, %s1550_s27 }
  0x38   : > { %p1547_p4 = pnand %p1545_p12, %p1531_p2  ;;  %p1553_p10 = scmp.lt.s32.totalorder %s1551_s29, %s1544_s17 }
  0x3a   : > { %p1548_p8 = pneg %p1547_p4  ;;  %p1554_p11 = por %p1553_p10, %p1552_p3 }
  0x3c   : > { %p1555_p5 = pnand %p1554_p11, %p1548_p8 }
  0x3e   : > { %1558 = shalt.err (!%p1555_p5)
}
  0x3f   : > { %s1649_s30 = smov 128   ;;  %s1650_s6 = smov 8  }
  0x40   : > { %1452 = dma.hbm_to_vmem [thread:$0]  (!%p1738_p0), %s1765_s3, 3072, %s1767_s28, %s1774_s5, %s1649_s30, %s1649_s30, %s1650_s6  }
  0x41   : > { %173 = sbr.rel (%p1730_p13) target bundleno = 407 (0x197), region = 28  ;;  %s1805_s26 = sand.u32 (!%p1730_p13), 1, %s1629_s10  }
  0x42   : > { %s1436_s7 = smul.u32 (!%p1730_p13), 192, %s1805_s26  ;;  %s176_s8 = scalar_lea.sflag (!%p1730_p13), [#allocation3], %s1805_s26 }
  0x43   : > { %p2432_p3 = scmp.ne.s32.totalorder (!%p1730_p13), %s2427_s19, 0 }
  0x44   : > { %s1809_s15 = scalar_lea.vmem (!%p1730_p13), [#allocation2], %s1436_s7 }
  0x48   : > { %1612 = dma.done.wait (%p2432_p3), %s176_s8, 3072  }
  0x49   : > { %1614 = vsyncadd (%p2432_p3), %s176_s8, 4294964224  ;;  %p2433_p8 = scmp.ne.s32.totalorder %s2426_s18, 0 }
  0x4b   : > { %1616 = dma.done.wait (%p2433_p8), [#allocation5], 16  }
  0x4c   : > { %1618 = vsyncadd (%p2433_p8), [#allocation5], 4294967280 }
  0x4d   : > { %188 = sfence }
  0x4e   : > { %s1310_s22 = sld [smem:[#allocation6 + $0x2]]  ;;  %s1309_s24 = sld [smem:[#allocation6 + $0x1]]  ;;  %v1820_v0 = vld [vmem:[%s1809_s15] sm:$0xff]  ;;  %v1823_v1 = vld [vmem:[%s1809_s15 + $0x8] sm:$0xff]  ;;  %v1905_v50 = vld [vmem:[%s1809_s15 + $0x18] sm:$0xff]  ;;  %vm450_vm0 = vcmask 130048  }
  0x4f   : > { %s1312_s28 = sld [smem:[#allocation6 + $0x4]]  ;;  %s1313_s19 = sld [smem:[#allocation6 + $0x5]]  ;;  %v1832_v8 = vld [vmem:[%s1809_s15 + $0x9] sm:$0xff]  ;;  %v1835_v10 = vld [vmem:[%s1809_s15 + $0x1] sm:$0xff]  ;;  %v1919_v58 = vld [vmem:[%s1809_s15 + $0x19] sm:$0xff] }
  0x50   : > { %s1651_s18 = smov 126   ;;  %s1652_s3 = smov 127   ;;  %v1846_v16 = vld [vmem:[%s1809_s15 + $0xa] sm:$0xff]  ;;  %v1849_v18 = vld [vmem:[%s1809_s15 + $0x2] sm:$0xff] }
  0x51   : > { %s1315_s5 = sld [smem:[#allocation6 + $0x7]]  ;;  %s1316_s16 = sld [smem:[#allocation6 + $0x8]]  ;;  %v1860_v24 = vld [vmem:[%s1809_s15 + $0x68] sm:$0xff]  ;;  %v1863_v26 = vld [vmem:[%s1809_s15 + $0x60] sm:$0xff] }
  0x52   : > { %s1318_s17 = sld [smem:[#allocation6 + $0x25]]  ;;  %s1319_s23 = sld [smem:[#allocation6 + $0x26]]  ;;  %v1874_v32 = vld [vmem:[%s1809_s15 + $0x69] sm:$0xff]  ;;  %v1877_v34 = vld [vmem:[%s1809_s15 + $0x61] sm:$0xff] }
  0x53   : > { %s1321_s27 = sld [smem:[#allocation6 + $0x28]]  ;;  %s1322_s29 = sld [smem:[#allocation6 + $0x29]]  ;;  %v1888_v40 = vld [vmem:[%s1809_s15 + $0x6a] sm:$0xff]  ;;  %v1891_v42 = vld [vmem:[%s1809_s15 + $0x62] sm:$0xff] }
  0x54   : > { %v271_v2 = vstv %s1310_s22  ;;  %v258_v4 = vstv %s1309_s24  ;;  %s1324_s30 = sld [smem:[#allocation6 + $0x2b]]  ;;  %s1325_s6 = sld [smem:[#allocation6 + $0x2c]]  ;;  %v1902_v48 = vld [vmem:[%s1809_s15 + $0x20] sm:$0xff] }
  0x55   : > { %v272_v3 = vmul.f32 %v271_v2, %v1820_v0  ;;  %v259_v5 = vmul.f32 %v258_v4, %v1820_v0  ;;  %v273_v6 = vmul.f32 %v271_v2, %v1823_v1  ;;  %v260_v7 = vmul.f32 %v258_v4, %v1823_v1  ;;  %s1333_s7 = sld [smem:[#allocation6 + $0xa]]  ;;  %s1334_s8 = sld [smem:[#allocation6 + $0xb]]  ;;  %v1916_v56 = vld [vmem:[%s1809_s15 + $0x21] sm:$0xff] }
  0x56   : > { %v291_v9 = vstv %s1312_s28  ;;  %v304_v13 = vstv %s1313_s19  ;;  %s1336_s22 = sld [smem:[#allocation6 + $0xd]]  ;;  %s1337_s24 = sld [smem:[#allocation6 + $0xe]]  ;;  %v1930_v2 = vld [vmem:[%s1809_s15 + $0x22] sm:$0xff]  ;;  %v1933_v4 = vld [vmem:[%s1809_s15 + $0x1a] sm:$0xff] }
  0x57   : > { %276 = vrot.lane.b32.xlu1 %v272_v3, %s1651_s18  ;;  %263 = vrot.lane.b32.xlu0 %v259_v5, %s1652_s3  ;;  %v293_v11 = vmul.f32 %v291_v9, %v1832_v8  ;;  %v292_v12 = vmul.f32 %v291_v9, %v1835_v10  ;;  %v306_v14 = vmul.f32 %v304_v13, %v1832_v8  ;;  %v324_v17 = vstv %s1315_s5  ;;  %s1339_s28 = sld [smem:[#allocation6 + $0x10]]  ;;  %s1340_s19 = sld [smem:[#allocation6 + $0x11]] }
  0x58   : > { %v305_v15 = vmul.f32 %v304_v13, %v1835_v10  ;;  %v326_v19 = vmul.f32 %v324_v17, %v1846_v16  ;;  %v325_v20 = vmul.f32 %v324_v17, %v1849_v18  ;;  %v337_v21 = vstv %s1316_s16  ;;  %s1342_s5 = sld [smem:[#allocation6 + $0x2e]]  ;;  %s1343_s16 = sld [smem:[#allocation6 + $0x2f]] }
  0x59   : > { %v339_v22 = vmul.f32 %v337_v21, %v1846_v16  ;;  %v338_v23 = vmul.f32 %v337_v21, %v1849_v18  ;;  %v358_v25 = vstv %s1318_s17  ;;  %v371_v29 = vstv %s1319_s23  ;;  %s1345_s17 = sld [smem:[#allocation6 + $0x31]]  ;;  %s1346_s23 = sld [smem:[#allocation6 + $0x32]] }
  0x5a   : > { %v360_v27 = vmul.f32 %v1860_v24, %v358_v25  ;;  %v359_v28 = vmul.f32 %v1863_v26, %v358_v25  ;;  %v373_v30 = vmul.f32 %v1860_v24, %v371_v29  ;;  %v372_v31 = vmul.f32 %v1863_v26, %v371_v29  ;;  %v1961_v25 = vld [vmem:[%s1809_s15 + $0x79] sm:$0xff]  ;;  %p2434_p13 = scmp.ne.s32.totalorder %s2428_s20, 0 }
  0x5b   : > { %278 = vrot.lane.b32.xlu1 %v273_v6, %s1651_s18  ;;  %265 = vrot.lane.b32.xlu0 %v260_v7, %s1652_s3  ;;  %v391_v33 = vstv %s1321_s27  ;;  %v404_v37 = vstv %s1322_s29  ;;  %s1348_s27 = sld [smem:[#allocation6 + $0x34]]  ;;  %s1349_s29 = sld [smem:[#allocation6 + $0x35]] }
  0x5c   : > { %v393_v35 = vmul.f32 %v1874_v32, %v391_v33  ;;  %v392_v36 = vmul.f32 %v1877_v34, %v391_v33  ;;  %v406_v38 = vmul.f32 %v1874_v32, %v404_v37  ;;  %v405_v39 = vmul.f32 %v1877_v34, %v404_v37  ;;  %v1972_v33 = vld [vmem:[%s1809_s15 + $0x82] sm:$0xff] }
  0x5d   : > { %v424_v41 = vstv %s1324_s30  ;;  %v437_v45 = vstv %s1325_s6  ;;  %v500_v49 = vstv %s1333_s7  ;;  %v513_v53 = vstv %s1334_s8  ;;  %s1365_s30 = sld [smem:[#allocation6 + $0x13]]  ;;  %s1397_s6 = sld [smem:[#allocation6 + $0x1c]] }
  0x5e   : > { %v426_v43 = vmul.f32 %v1888_v40, %v424_v41  ;;  %v425_v44 = vmul.f32 %v1891_v42, %v424_v41  ;;  %v439_v46 = vmul.f32 %v1888_v40, %v437_v45  ;;  %v438_v47 = vmul.f32 %v1891_v42, %v437_v45  ;;  %s1366_s7 = sld [smem:[#allocation6 + $0x14]]  ;;  %s1398_s8 = sld [smem:[#allocation6 + $0x1d]] }
  0x5f   : > { %298 = vrot.lane.b32.xlu1 %v293_v11, %s1652_s3  ;;  %296 = vrot.lane.b32.xlu0 %v292_v12, %s1652_s3  ;;  %v502_v51 = vmul.f32 %v1902_v48, %v500_v49  ;;  %v501_v52 = vmul.f32 %v1905_v50, %v500_v49  ;;  %v515_v54 = vmul.f32 %v1902_v48, %v513_v53  ;;  %v533_v57 = vstv %s1336_s22  ;;  %v1944_v12 = vld [vmem:[%s1809_s15 + $0x80] sm:$0xff]  ;;  %s1368_s22 = sld [smem:[#allocation6 + $0x16]] }
  0x60   : > { %v514_v55 = vmul.f32 %v1905_v50, %v513_v53  ;;  %v535_v59 = vmul.f32 %v1916_v56, %v533_v57  ;;  %v534_v60 = vmul.f32 %v1919_v58, %v533_v57  ;;  %v546_v61 = vstv %s1337_s24  ;;  %v1999_v53 = vld [vmem:[%s1809_s15 + $0x48] sm:$0xff]  ;;  %s2009_s24 = sld [smem:[#allocation6]] }
  0x61   : > { %v548_v62 = vmul.f32 %v1916_v56, %v546_v61  ;;  %v547_v63 = vmul.f32 %v1919_v58, %v546_v61  ;;  %v566_v3 = vstv %s1339_s28  ;;  %v579_v7 = vstv %s1340_s19  ;;  %s1400_s28 = sld [smem:[#allocation6 + $0x1f]] }
  0x62   : > { %v568_v5 = vmul.f32 %v1930_v2, %v566_v3  ;;  %v567_v6 = vmul.f32 %v1933_v4, %v566_v3  ;;  %v581_v9 = vmul.f32 %v1930_v2, %v579_v7  ;;  %v580_v11 = vmul.f32 %v1933_v4, %v579_v7  ;;  %v2016_v3 = vld [vmem:[%s1809_s15 + $0x39] sm:$0xff]  ;;  %s1369_s19 = sld [smem:[#allocation6 + $0x17]] }
  0x63   : > { %311 = vrot.lane.b32.xlu1 %v306_v14, %s1651_s18  ;;  %309 = vrot.lane.b32.xlu0 %v305_v15, %s1651_s18  ;;  %v600_v13 = vstv %s1342_s5  ;;  %v1947_v14 = vld [vmem:[%s1809_s15 + $0x78] sm:$0xff]  ;;  %s2018_s5 = sld [smem:[#allocation6 + $0x3]] }
  0x64   : > { %v602_v15 = vmul.f32 %v1944_v12, %v600_v13  ;;  %v601_v17 = vmul.f32 %v1947_v14, %v600_v13  ;;  %v646_v29 = vstv %s1346_s23  ;;  %v742_v45 = vstv %s1365_s30  ;;  %v2029_v13 = vld [vmem:[%s1809_s15 + $0x51] sm:$0xff]  ;;  %s2044_s23 = sld [smem:[#allocation6 + $0x6]]  ;;  %s2069_s30 = sld [smem:[#allocation6 + $0x24]] }
  0x65   : > { %v755_v57 = vstv %s1366_s7  ;;  %v997_v61 = vstv %s1398_s8  ;;  %s2092_s7 = sld [smem:[#allocation6 + $0x37]] }
  0x66   : > { %s2095_s8 = sld [smem:[#allocation6 + $0x27]] }
  0x67   : > { %331 = vrot.lane.b32.xlu1 %v326_v19, %s1652_s3  ;;  %329 = vrot.lane.b32.xlu0 %v325_v20, %s1652_s3  ;;  %v613_v19 = vstv %s1343_s16  ;;  %s2031_s16 = sld [smem:[#allocation6 + $0x20]] }
  0x68   : > { %v615_v20 = vmul.f32 %v1944_v12, %v613_v19  ;;  %v614_v21 = vmul.f32 %v1947_v14, %v613_v19 }
  0x6b   : > { %344 = vrot.lane.b32.xlu1 %v339_v22, %s1651_s18  ;;  %342 = vrot.lane.b32.xlu0 %v338_v23, %s1651_s18  ;;  %v1958_v22 = vld [vmem:[%s1809_s15 + $0x81] sm:$0xff]  ;;  %v633_v23 = vstv %s1345_s17  ;;  %s2042_s17 = sld [smem:[#allocation6 + $0x19]] }
  0x6f   : > { %365 = vrot.lane.b32.xlu1 %v360_v27, %s1652_s3  ;;  %363 = vrot.lane.b32.xlu0 %v359_v28, %s1652_s3  ;;  %v635_v27 = vmul.f32 %v1958_v22, %v633_v23  ;;  %v634_v28 = vmul.f32 %v1961_v25, %v633_v23  ;;  %v788_v23 = vstv %s1369_s19  ;;  %s2131_s19 = sld [smem:[#allocation6 + $0x41]] }
  0x73   : > { %378 = vrot.lane.b32.xlu1 %v373_v30, %s1651_s18  ;;  %376 = vrot.lane.b32.xlu0 %v372_v31, %s1651_s18  ;;  %v648_v30 = vmul.f32 %v1958_v22, %v646_v29  ;;  %v647_v31 = vmul.f32 %v1961_v25, %v646_v29 }
  0x77   : > { %398 = vrot.lane.b32.xlu1 %v393_v35, %s1652_s3  ;;  %396 = vrot.lane.b32.xlu0 %v392_v36, %s1652_s3  ;;  %v666_v35 = vstv %s1348_s27  ;;  %v1975_v36 = vld [vmem:[%s1809_s15 + $0x7a] sm:$0xff]  ;;  %s2053_s27 = sld [smem:[#allocation6 + $0x22]] }
  0x78   : > { %v668_v37 = vmul.f32 %v1972_v33, %v666_v35 }
  0x7b   : > { %411 = vrot.lane.b32.xlu1 %v406_v38, %s1651_s18  ;;  %409 = vrot.lane.b32.xlu0 %v405_v39, %s1651_s18  ;;  %v667_v38 = vmul.f32 %v1975_v36, %v666_v35  ;;  %v679_v39 = vstv %s1349_s29  ;;  %s2064_s29 = sld [smem:[#allocation6 + $0x1a]] }
  0x7c   : > { %v681_v41 = vmul.f32 %v1972_v33, %v679_v39 }
  0x7f   : > { %431 = vrot.lane.b32.xlu1 %v426_v43, %s1652_s3  ;;  %429 = vrot.lane.b32.xlu0 %v425_v44, %s1652_s3  ;;  %v680_v43 = vmul.f32 %v1975_v36, %v679_v39  ;;  %v1986_v44 = vld [vmem:[%s1809_s15 + $0x38] sm:$0xff] }
  0x83   : > { %444 = vrot.lane.b32.xlu1 %v439_v46, %s1651_s18  ;;  %442 = vrot.lane.b32.xlu0 %v438_v47, %s1651_s18  ;;  %v1989_v46 = vld [vmem:[%s1809_s15 + $0x30] sm:$0xff]  ;;  %v744_v47 = vmul.f32 %v1986_v44, %v742_v45 }
  0x84   : > { %v743_v49 = vmul.f32 %v1989_v46, %v742_v45 }
  0x87   : > { %507 = vrot.lane.b32.xlu1 %v502_v51, %s1652_s3  ;;  %505 = vrot.lane.b32.xlu0 %v501_v52, %s1652_s3  ;;  %v1996_v51 = vld [vmem:[%s1809_s15 + $0x50] sm:$0xff]  ;;  %v984_v52 = vstv %s1397_s6  ;;  %s2080_s6 = sld [smem:[#allocation6 + $0x23]] }
  0x8b   : > { %520 = vrot.lane.b32.xlu1 %v515_v54, %s1651_s18  ;;  %518 = vrot.lane.b32.xlu0 %v514_v55, %s1651_s18  ;;  %v986_v54 = vmul.f32 %v1996_v51, %v984_v52  ;;  %v985_v55 = vmul.f32 %v1999_v53, %v984_v52  ;;  %v2061_v52 = vld [vmem:[%s1809_s15 + $0x3a] sm:$0xff] }
  0x8f   : > { %540 = vrot.lane.b32.xlu1 %v535_v59, %s1652_s3  ;;  %538 = vrot.lane.b32.xlu0 %v534_v60, %s1652_s3  ;;  %v757_v59 = vmul.f32 %v1986_v44, %v755_v57  ;;  %v756_v60 = vmul.f32 %v1989_v46, %v755_v57 }
  0x93   : > { %553 = vrot.lane.b32.xlu1 %v548_v62, %s1651_s18  ;;  %551 = vrot.lane.b32.xlu0 %v547_v63, %s1651_s18  ;;  %v999_v62 = vmul.f32 %v1996_v51, %v997_v61  ;;  %v998_v63 = vmul.f32 %v1999_v53, %v997_v61 }
  0x97   : > { %573 = vrot.lane.b32.xlu1 %v568_v5, %s1652_s3  ;;  %571 = vrot.lane.b32.xlu0 %v567_v6, %s1652_s3  ;;  %v775_v5 = vstv %s1368_s22  ;;  %v2021_v6 = vld [vmem:[%s1809_s15 + $0x31] sm:$0xff]  ;;  %s2103_s22 = sld [smem:[#allocation6 + $0x40]] }
  0x98   : > { %v777_v7 = vmul.f32 %v2016_v3, %v775_v5 }
  0x9b   : > { %586 = vrot.lane.b32.xlu1 %v581_v9, %s1651_s18  ;;  %584 = vrot.lane.b32.xlu0 %v580_v11, %s1651_s18  ;;  %v776_v9 = vmul.f32 %v2021_v6, %v775_v5  ;;  %v253_v11 = vstv %s2009_s24  ;;  %v2077_v5 = vld [vmem:[%s1809_s15 + $0x52] sm:$0xff]  ;;  %s2114_s24 = sld [smem:[#allocation6 + $0x38]] }
  0x9c   : > { %v254_v19 = vmul.f32 %v253_v11, %v1820_v0  ;;  %v255_v0 = vmul.f32 %v253_v11, %v1823_v1 }
  0x9f   : > { %607 = vrot.lane.b32.xlu1 %v602_v15, %s1652_s3  ;;  %605 = vrot.lane.b32.xlu0 %v601_v17, %s1652_s3  ;;  %v1017_v15 = vstv %s1400_s28  ;;  %v2034_v17 = vld [vmem:[%s1809_s15 + $0x49] sm:$0xff]  ;;  %s2120_s28 = sld [smem:[#allocation6 + $0x2a]] }
  0xa3   : > { %620 = vrot.lane.b32.xlu1 %v615_v20, %s1651_s18  ;;  %618 = vrot.lane.b32.xlu0 %v614_v21, %s1651_s18  ;;  %v1019_v20 = vmul.f32 %v2029_v13, %v1017_v15  ;;  %v1018_v21 = vmul.f32 %v2034_v17, %v1017_v15 }
  0xa7   : > { %640 = vrot.lane.b32.xlu1 %v635_v27, %s1652_s3  ;;  %638 = vrot.lane.b32.xlu0 %v634_v28, %s1652_s3  ;;  %v286_v27 = vstv %s2018_s5  ;;  %s2142_s5 = sld [smem:[#allocation6 + $0x3a]] }
  0xa8   : > { %v287_v35 = vmul.f32 %v286_v27, %v1835_v10  ;;  %v288_v1 = vmul.f32 %v286_v27, %v1832_v8 }
  0xab   : > { %653 = vrot.lane.b32.xlu1 %v648_v30, %s1651_s18  ;;  %651 = vrot.lane.b32.xlu0 %v647_v31, %s1651_s18  ;;  %v790_v31 = vmul.f32 %v2016_v3, %v788_v23 }
  0xaf   : > { %673 = vrot.lane.b32.xlu1 %v668_v37, %s1652_s3  ;;  %671 = vrot.lane.b32.xlu0 %v667_v38, %s1652_s3  ;;  %v789_v37 = vmul.f32 %v2021_v6, %v788_v23  ;;  %v1030_v38 = vstv %s2031_s16  ;;  %s2151_s16 = sld [smem:[#allocation6 + $0x43]] }
  0xb0   : > { %v1032_v10 = vmul.f32 %v2029_v13, %v1030_v38 }
  0xb3   : > { %686 = vrot.lane.b32.xlu1 %v681_v41, %s1651_s18  ;;  %684 = vrot.lane.b32.xlu0 %v680_v43, %s1651_s18 }
  0xb7   : > { %749 = vrot.lane.b32.xlu1 %v744_v47, %s1652_s3  ;;  %747 = vrot.lane.b32.xlu0 %v743_v49, %s1652_s3  ;;  %v1031_v49 = vmul.f32 %v2034_v17, %v1030_v38 }
  0xbb   : > { %991 = vrot.lane.b32.xlu1 %v986_v54, %s1652_s3  ;;  %989 = vrot.lane.b32.xlu0 %v985_v55, %s1652_s3  ;;  %v808_v54 = vstv %s2042_s17  ;;  %s2154_s17 = sld [smem:[#allocation6 + $0x9]] }
  0xbf   : > { %762 = vrot.lane.b32.xlu1 %v757_v59, %s1651_s18  ;;  %760 = vrot.lane.b32.xlu0 %v756_v60, %s1651_s18  ;;  %v2067_v59 = vld [vmem:[%s1809_s15 + $0x32] sm:$0xff]  ;;  %v319_v60 = vstv %s2044_s23  ;;  %s2164_s23 = sld [smem:[#allocation6 + $0x3b]] }
  0xc3   : > { %1004 = vrot.lane.b32.xlu1 %v999_v62, %s1651_s18  ;;  %1002 = vrot.lane.b32.xlu0 %v998_v63, %s1651_s18  ;;  %v810_v62 = vmul.f32 %v2061_v52, %v808_v54  ;;  %v809_v63 = vmul.f32 %v2067_v59, %v808_v54 }
  0xc7   : > { %782 = vrot.lane.b32.xlu1 %v777_v7, %s1652_s3  ;;  %780 = vrot.lane.b32.xlu0 %v776_v9, %s1652_s3  ;;  %v1050_v7 = vstv %s2053_s27  ;;  %s2169_s27 = sld [smem:[#allocation6 + $0xc]] }
  0xc9   : > { %v277_v28 = vpop.permute.xlu1 %276  ;;  %v264_v29 = vpop.permute.xlu0 %263 }
  0xca   : > { %v269_v30 = vadd.f32 %v264_v29, %v254_v19  ;;  %v321_v19 = vmul.f32 %v319_v60, %v1846_v16  ;;  %v1052_v29 = vmul.f32 %v2077_v5, %v1050_v7 }
  0xcb   : > { %1024 = vrot.lane.b32.xlu1 %v1019_v20, %s1652_s3  ;;  %1022 = vrot.lane.b32.xlu0 %v1018_v21, %s1652_s3  ;;  %v320_v20 = vmul.f32 %v319_v60, %v1849_v18  ;;  %v2085_v21 = vld [vmem:[%s1809_s15 + $0x4a] sm:$0xff]  ;;  %v2111_v60 = vld [vmem:[%s1809_s15 + $0x98] sm:$0xff] }
  0xcc   : > { %v282_v39 = vadd.f32 %v277_v28, %v269_v30  ;;  %v1051_v30 = vmul.f32 %v2085_v21, %v1050_v7  ;;  %v386_v7 = vstv %s2095_s8  ;;  %s2202_s8 = sld [smem:[#allocation6 + $0xf]] }
  0xcd   : > { %v279_v41 = vpop.permute.xlu1 %278  ;;  %v266_v43 = vpop.permute.xlu0 %265 }
  0xce   : > { %v270_v45 = vadd.f32 %v266_v43, %v255_v0  ;;  %v289_v47 = vadd.f32 %v287_v35, %v282_v39  ;;  %v821_v0 = vstv %s2064_s29  ;;  %v353_v35 = vstv %s2069_s30  ;;  %s1308_s29 = sshll.u32 %s1805_s26, 6  ;;  %s2180_s30 = sld [smem:[#allocation6 + $0x44]] }
  0xcf   : > { %795 = vrot.lane.b32.xlu1 %v790_v31, %s1651_s18  ;;  %793 = vrot.lane.b32.xlu0 %v789_v37, %s1651_s18  ;;  %v823_v38 = vmul.f32 %v2061_v52, %v821_v0  ;;  %v355_v43 = vmul.f32 %v1860_v24, %v353_v35 }
  0xd0   : > { %v283_v55 = vadd.f32 %v279_v41, %v270_v45  ;;  %v822_v41 = vmul.f32 %v2067_v59, %v821_v0  ;;  %v1063_v45 = vstv %s2080_s6  ;;  %v2135_v0 = vld [vmem:[%s1809_s15 + $0xa8] sm:$0xff]  ;;  %s2188_s6 = scalar_lea.vmem [#allocation7], %s1308_s29  ;;  %s2309_s29 = sld [smem:[#allocation6 + $0x36]] }
  0xd1   : > { %v299_v57 = vpop.permute.xlu1 %298  ;;  %v297_v8 = vpop.permute.xlu0 %296  ;;  %v1064_v24 = vmul.f32 %v2085_v21, %v1063_v45 }
  0xd2   : > { %v290_v61 = vadd.f32 %v288_v1, %v283_v55  ;;  %v302_v11 = vadd.f32 %v297_v8, %v289_v47 }
  0xd3   : > { %1037 = vrot.lane.b32.xlu1 %v1032_v10, %s1651_s18  ;;  %1035 = vrot.lane.b32.xlu0 %v1031_v49, %s1651_s18  ;;  %v354_v10 = vmul.f32 %v1863_v26, %v353_v35 }
  0xd4   : > { %v303_v9 = vadd.f32 %v299_v57, %v290_v61  ;;  %v1065_v57 = vmul.f32 %v2077_v5, %v1063_v45  ;;  %v842_v61 = vstv %s2092_s7  ;;  %s2196_s7 = sld [smem:[#allocation6 + $0x3d]] }
  0xd5   : > { %v312_v15 = vpop.permute.xlu1 %311  ;;  %v310_v23 = vpop.permute.xlu0 %309 }
  0xd6   : > { %v316_v27 = vadd.f32 %v312_v15, %v303_v9  ;;  %v315_v28 = vadd.f32 %v310_v23, %v302_v11  ;;  %v844_v11 = vmul.f32 %v2111_v60, %v842_v61  ;;  %v2128_v23 = vld [vmem:[%s1809_s15 + $0xb0] sm:$0xff] }
  0xd7   : > { %815 = vrot.lane.b32.xlu1 %v810_v62, %s1652_s3  ;;  %813 = vrot.lane.b32.xlu0 %v809_v63, %s1652_s3  ;;  %v2117_v63 = vld [vmem:[%s1809_s15 + $0x90] sm:$0xff] }
  0xd8   : > { %v323_v31 = vadd.f32 %v321_v19, %v316_v27  ;;  %v322_v18 = vadd.f32 %v320_v20, %v315_v28  ;;  %v843_v19 = vmul.f32 %v2117_v63, %v842_v61  ;;  %v388_v20 = vmul.f32 %v1874_v32, %v386_v7 }
  0xd9   : > { %v332_v16 = vpop.permute.xlu1 %331  ;;  %v330_v37 = vpop.permute.xlu0 %329  ;;  %v1084_v27 = vstv %s2103_s22  ;;  %s2210_s22 = sld [smem:[#allocation6 + $0x46]] }
  0xda   : > { %v336_v39 = vadd.f32 %v332_v16, %v323_v31  ;;  %v335_v1 = vadd.f32 %v330_v37, %v322_v18  ;;  %v1086_v32 = vmul.f32 %v2128_v23, %v1084_v27  ;;  %v1085_v37 = vmul.f32 %v2135_v0, %v1084_v27 }
  0xdb   : > { %1057 = vrot.lane.b32.xlu1 %v1052_v29, %s1652_s3  ;;  %1055 = vrot.lane.b32.xlu0 %v1051_v30, %s1652_s3  ;;  %v387_v30 = vmul.f32 %v1877_v34, %v386_v7  ;;  %v2161_v7 = vld [vmem:[%s1809_s15 + $0x99] sm:$0xff] }
  0xdd   : > { %v345_v47 = vpop.permute.xlu1 %344  ;;  %v343_v54 = vpop.permute.xlu0 %342 }
  0xde   : > { %v349_v49 = vadd.f32 %v345_v47, %v336_v39  ;;  %v348_v55 = vadd.f32 %v343_v54, %v335_v1 }
  0xdf   : > { %828 = vrot.lane.b32.xlu1 %v823_v38, %s1651_s18  ;;  %826 = vrot.lane.b32.xlu0 %v822_v41, %s1651_s18  ;;  %v855_v38 = vstv %s2114_s24  ;;  %v419_v41 = vstv %s2120_s28  ;;  %s2221_s24 = sld [smem:[#allocation6 + $0x3e]]  ;;  %s2227_s28 = sld [smem:[#allocation6 + $0x2d]] }
  0xe0   : > { %v357_v8 = vadd.f32 %v355_v43, %v349_v49  ;;  %v356_v62 = vadd.f32 %v354_v10, %v348_v55  ;;  %v857_v45 = vmul.f32 %v2111_v60, %v855_v38  ;;  %v856_v47 = vmul.f32 %v2117_v63, %v855_v38 }
  0xe1   : > { %v366_v26 = vpop.permute.xlu1 %365  ;;  %v364_v9 = vpop.permute.xlu0 %363  ;;  %v421_v10 = vmul.f32 %v1888_v40, %v419_v41  ;;  %v1097_v49 = vstv %s2131_s19  ;;  %s2238_s19 = sld [smem:[#allocation6 + $0x47]] }
  0xe2   : > { %v370_v15 = vadd.f32 %v366_v26, %v357_v8  ;;  %v369_v28 = vadd.f32 %v364_v9, %v356_v62  ;;  %v1099_v26 = vmul.f32 %v2128_v23, %v1097_v49  ;;  %v1098_v62 = vmul.f32 %v2135_v0, %v1097_v49 }
  0xe3   : > { %1070 = vrot.lane.b32.xlu1 %v1065_v57, %s1651_s18  ;;  %1068 = vrot.lane.b32.xlu0 %v1064_v24, %s1651_s18  ;;  %v420_v57 = vmul.f32 %v1891_v42, %v419_v41  ;;  %v875_v42 = vstv %s2142_s5  ;;  %s2250_s5 = sld [smem:[#allocation6 + $0x30]] }
  0xe5   : > { %v379_v29 = vpop.permute.xlu1 %378  ;;  %v377_v31 = vpop.permute.xlu0 %376 }
  0xe6   : > { %v383_v16 = vadd.f32 %v379_v29, %v370_v15  ;;  %v382_v18 = vadd.f32 %v377_v31, %v369_v28  ;;  %v2167_v15 = vld [vmem:[%s1809_s15 + $0x91] sm:$0xff] }
  0xe7   : > { %849 = vrot.lane.b32.xlu1 %v844_v11, %s1652_s3  ;;  %847 = vrot.lane.b32.xlu0 %v843_v19, %s1652_s3  ;;  %v876_v28 = vmul.f32 %v2167_v15, %v875_v42  ;;  %v2177_v29 = vld [vmem:[%s1809_s15 + $0xb1] sm:$0xff] }
  0xe8   : > { %v390_v35 = vadd.f32 %v388_v20, %v383_v16  ;;  %v389_v34 = vadd.f32 %v387_v30, %v382_v18  ;;  %v877_v20 = vmul.f32 %v2161_v7, %v875_v42  ;;  %v1117_v30 = vstv %s2151_s16  ;;  %s1367_s16 = sld [smem:[#allocation6 + $0x15]] }
  0xe9   : > { %v399_v39 = vpop.permute.xlu1 %398  ;;  %v397_v43 = vpop.permute.xlu0 %396  ;;  %v495_v18 = vstv %s2154_s17  ;;  %s1399_s17 = sld [smem:[#allocation6 + $0x1e]] }
  0xea   : > { %v403_v1 = vadd.f32 %v399_v39, %v390_v35  ;;  %v402_v54 = vadd.f32 %v397_v43, %v389_v34  ;;  %v1119_v39 = vmul.f32 %v2177_v29, %v1117_v30  ;;  %v497_v34 = vmul.f32 %v1902_v48, %v495_v18 }
  0xeb   : > { %1091 = vrot.lane.b32.xlu1 %v1086_v32, %s1652_s3  ;;  %1089 = vrot.lane.b32.xlu0 %v1085_v37, %s1652_s3  ;;  %v2184_v32 = vld [vmem:[%s1809_s15 + $0xa9] sm:$0xff]  ;;  %v888_v43 = vstv %s2164_s23  ;;  %s2290_s23 = sld [smem:[#allocation6 + $0x18]] }
  0xec   : > { %v1118_v41 = vmul.f32 %v2184_v32, %v1117_v30  ;;  %v890_v49 = vmul.f32 %v2161_v7, %v888_v43 }
  0xed   : > { %v412_v55 = vpop.permute.xlu1 %411  ;;  %v410_v24 = vpop.permute.xlu0 %409 }
  0xee   : > { %v416_v8 = vadd.f32 %v412_v55, %v403_v1  ;;  %v415_v61 = vadd.f32 %v410_v24, %v402_v54  ;;  %v496_v1 = vmul.f32 %v1905_v50, %v495_v18  ;;  %v889_v54 = vmul.f32 %v2167_v15, %v888_v43 }
  0xef   : > { %862 = vrot.lane.b32.xlu1 %v857_v45, %s1651_s18  ;;  %860 = vrot.lane.b32.xlu0 %v856_v47, %s1651_s18  ;;  %v528_v47 = vstv %s2169_s27  ;;  %s2300_s27 = sld [smem:[#allocation6 + $0x21]] }
  0xf0   : > { %v423_v40 = vadd.f32 %v421_v10, %v416_v8  ;;  %v422_v11 = vadd.f32 %v420_v57, %v415_v61  ;;  %v530_v55 = vmul.f32 %v1916_v56, %v528_v47  ;;  %v1130_v57 = vstv %s2180_s30  ;;  %s2314_s30 = sld [smem:[#allocation6 + $0x3f]] }
  0xf1   : > { %v432_v9 = vpop.permute.xlu1 %431  ;;  %v430_v19 = vpop.permute.xlu0 %429  ;;  %v529_v24 = vmul.f32 %v1919_v58, %v528_v47  ;;  %v1131_v56 = vmul.f32 %v2184_v32, %v1130_v57 }
  0xf2   : > { %v436_v27 = vadd.f32 %v432_v9, %v423_v40  ;;  %v435_v16 = vadd.f32 %v430_v19, %v422_v11  ;;  %v2218_v9 = vld [vmem:[%s1809_s15 + $0x9a] sm:$0xff]  ;;  %v908_v11 = vstv %s2196_s7  ;;  %s2319_s7 = sld [smem:[#allocation6 + $0x39]] }
  0xf3   : > { %1104 = vrot.lane.b32.xlu1 %v1099_v26, %s1651_s18  ;;  %1102 = vrot.lane.b32.xlu0 %v1098_v62, %s1651_s18  ;;  %v1132_v62 = vmul.f32 %v2177_v29, %v1130_v57  ;;  %v910_v30 = vmul.f32 %v2218_v9, %v908_v11 }
  0xf5   : > { %v445_v31 = vpop.permute.xlu1 %444  ;;  %v443_v37 = vpop.permute.xlu0 %442 }
  0xf6   : > { %v449_v35 = vadd.f32 %v445_v31, %v436_v27  ;;  %v448_v38 = vadd.f32 %v443_v37, %v435_v16  ;;  %v561_v27 = vstv %s2202_s8  ;;  %v1150_v37 = vstv %s2210_s22  ;;  %s2327_s8 = sld [smem:[#allocation6 + $0x42]]  ;;  %s2336_s22 = sld [smem:[#allocation6 + $0x3c]] }
  0xf7   : > { %882 = vrot.lane.b32.xlu1 %v877_v20, %s1652_s3  ;;  %880 = vrot.lane.b32.xlu0 %v876_v28, %s1652_s3  ;;  %v2224_v20 = vld [vmem:[%s1809_s15 + $0x92] sm:$0xff]  ;;  %v563_v18 = vmul.f32 %v1930_v2, %v561_v27 }
  0xf8   : > { %452 = vst.msk [vmem:[%s2188_s6 + $0x8] sm:$0xff] %vm450_vm0, %v449_v35  ;;  %451 = vst.msk [vmem:[%s2188_s6] sm:$0xff] %vm450_vm0, %v448_v38  ;;  %v909_v31 = vmul.f32 %v2224_v20, %v908_v11  ;;  %v2235_v35 = vld [vmem:[%s1809_s15 + $0xb2] sm:$0xff] }
  0xf9   : > { %v508_v45 = vpop.permute.xlu1 %507  ;;  %v506_v10 = vpop.permute.xlu0 %505  ;;  %v1152_v2 = vmul.f32 %v2235_v35, %v1150_v37 }
  0xfa   : > { %v512_v48 = vadd.f32 %v508_v45, %v497_v34  ;;  %v511_v50 = vadd.f32 %v506_v10, %v496_v1  ;;  %v562_v34 = vmul.f32 %v1933_v4, %v561_v27 }
  0xfb   : > { %1124 = vrot.lane.b32.xlu1 %v1119_v39, %s1652_s3  ;;  %1122 = vrot.lane.b32.xlu0 %v1118_v41, %s1652_s3  ;;  %v2242_v41 = vld [vmem:[%s1809_s15 + $0xaa] sm:$0xff]  ;;  %s1347_s15 = sld [smem:[#allocation6 + $0x33]] }
  0xfc   : > { %v1151_v10 = vmul.f32 %v2242_v41, %v1150_v37 }
  0xfd   : > { %v521_v8 = vpop.permute.xlu1 %520  ;;  %v519_v26 = vpop.permute.xlu0 %518 }
  0xfe   : > { %v525_v61 = vadd.f32 %v521_v8, %v512_v48  ;;  %v524_v40 = vadd.f32 %v519_v26, %v511_v50 }
  0xff   : > { %895 = vrot.lane.b32.xlu1 %v890_v49, %s1651_s18  ;;  %893 = vrot.lane.b32.xlu0 %v889_v54, %s1651_s18  ;;  %v921_v49 = vstv %s2221_s24  ;;  %s2343_s24 = sld [smem:[#allocation6 + $0x45]] }
 0x100   : > { %v532_v42 = vadd.f32 %v530_v55, %v525_v61  ;;  %v531_v19 = vadd.f32 %v529_v24, %v524_v40  ;;  %v595_v55 = vstv %s2227_s28  ;;  %v923_v57 = vmul.f32 %v2218_v9, %v921_v49  ;;  %s1433_s28 = sshll.u32 %s1637_s12, 10  ;;  %s1180_s12 = scalar_lea.sflag [#allocation4], %s1805_s26 }
 0x101   : > { %v541_v58 = vpop.permute.xlu1 %540  ;;  %v539_v28 = vpop.permute.xlu0 %538  ;;  %v922_v8 = vmul.f32 %v2224_v20, %v921_v49  ;;  %v597_v24 = vmul.f32 %v1944_v12, %v595_v55  ;;  %v1163_v61 = vstv %s2238_s19  ;;  %v628_v12 = vstv %s2250_s5  ;;  %s1196_s19 = sshll.u32 %s2188_s6, 4  ;;  %s2366_s19 = int_to_ptr.vmem [resolvable:$true] %s1196_s19 }
 0x102   : > { %v545_v16 = vadd.f32 %v541_v58, %v532_v42  ;;  %v544_v38 = vadd.f32 %v539_v28, %v531_v19  ;;  %v1165_v58 = vmul.f32 %v2235_v35, %v1163_v61  ;;  %v1164_v27 = vmul.f32 %v2242_v41, %v1163_v61 }
 0x103   : > { %1137 = vrot.lane.b32.xlu1 %v1132_v62, %s1651_s18  ;;  %1135 = vrot.lane.b32.xlu0 %v1131_v56, %s1651_s18  ;;  %v596_v62 = vmul.f32 %v1947_v14, %v595_v55 }
 0x105   : > { %v554_v39 = vpop.permute.xlu1 %553  ;;  %v552_v45 = vpop.permute.xlu0 %551 }
 0x106   : > { %v558_v43 = vadd.f32 %v554_v39, %v545_v16  ;;  %v557_v1 = vadd.f32 %v552_v45, %v544_v38  ;;  %v629_v38 = vmul.f32 %v1961_v25, %v628_v12 }
 0x107   : > { %915 = vrot.lane.b32.xlu1 %v910_v30, %s1652_s3  ;;  %913 = vrot.lane.b32.xlu0 %v909_v31, %s1652_s3  ;;  %v630_v31 = vmul.f32 %v1958_v22, %v628_v12 }
 0x108   : > { %v565_v47 = vadd.f32 %v563_v18, %v558_v43  ;;  %v564_v54 = vadd.f32 %v562_v34, %v557_v1 }
 0x109   : > { %v574_v48 = vpop.permute.xlu1 %573  ;;  %v572_v4 = vpop.permute.xlu0 %571 }
 0x10a   : > { %v578_v50 = vadd.f32 %v574_v48, %v565_v47  ;;  %v577_v26 = vadd.f32 %v572_v4, %v564_v54  ;;  %v661_v47 = vstv %s1347_s15 }
 0x10b   : > { %1157 = vrot.lane.b32.xlu1 %v1152_v2, %s1652_s3  ;;  %1155 = vrot.lane.b32.xlu0 %v1151_v10, %s1652_s3  ;;  %v663_v48 = vmul.f32 %v1972_v33, %v661_v47  ;;  %v662_v22 = vmul.f32 %v1975_v36, %v661_v47  ;;  %s1396_s3 = sld [smem:[#allocation6 + $0x1b]] }
 0x10d   : > { %v587_v40 = vpop.permute.xlu1 %586  ;;  %v585_v56 = vpop.permute.xlu0 %584 }
 0x10e   : > { %v591_v42 = vadd.f32 %v587_v40, %v578_v50  ;;  %v590_v11 = vadd.f32 %v585_v56, %v577_v26 }
 0x10f   : > { %928 = vrot.lane.b32.xlu1 %v923_v57, %s1651_s18  ;;  %926 = vrot.lane.b32.xlu0 %v922_v8, %s1651_s18 }
 0x110   : > { %v599_v19 = vadd.f32 %v597_v24, %v591_v42  ;;  %v598_v30 = vadd.f32 %v596_v62, %v590_v11 }
 0x111   : > { %v608_v28 = vpop.permute.xlu1 %607  ;;  %v606_v16 = vpop.permute.xlu0 %605 }
 0x112   : > { %v612_v14 = vadd.f32 %v608_v28, %v599_v19  ;;  %v611_v18 = vadd.f32 %v606_v16, %v598_v30 }
 0x113   : > { %1170 = vrot.lane.b32.xlu1 %v1165_v58, %s1651_s18  ;;  %1168 = vrot.lane.b32.xlu0 %v1164_v27, %s1651_s18  ;;  %s1364_s18 = sld [smem:[#allocation6 + $0x12]] }
 0x115   : > { %v621_v37 = vpop.permute.xlu1 %620  ;;  %v619_v34 = vpop.permute.xlu0 %618 }
 0x116   : > { %v625_v39 = vadd.f32 %v621_v37, %v612_v14  ;;  %v624_v43 = vadd.f32 %v619_v34, %v611_v18 }
 0x118   : > { %v632_v45 = vadd.f32 %v630_v31, %v625_v39  ;;  %v631_v2 = vadd.f32 %v629_v38, %v624_v43 }
 0x119   : > { %v641_v1 = vpop.permute.xlu1 %640  ;;  %v639_v10 = vpop.permute.xlu0 %638  ;;  %v737_v47 = vstv %s1364_s18  ;;  %s2364_s18 = scalar_lea.hbm %s2421_s2, %s1433_s28 }
 0x11a   : > { %v645_v49 = vadd.f32 %v641_v1, %v632_v45  ;;  %v644_v54 = vadd.f32 %v639_v10, %v631_v2 }
 0x11d   : > { %v654_v55 = vpop.permute.xlu1 %653  ;;  %v652_v57 = vpop.permute.xlu0 %651 }
 0x11e   : > { %v658_v4 = vadd.f32 %v654_v55, %v645_v49  ;;  %v657_v25 = vadd.f32 %v652_v57, %v644_v54  ;;  %v738_v54 = vmul.f32 %v1989_v46, %v737_v47  ;;  %v979_v55 = vstv %s1396_s3  ;;  %s1559_s3 = scalar_lea.vmem %s2366_s19, 1024 }
 0x11f   : > { %v770_v57 = vstv %s1367_s16  ;;  %p1560_p9 = scmp.ne.s32.totalorder %s2366_s19, %s1559_s3  ;;  %s1653_s16 = smov [#allocation7]  }
 0x120   : > { %v665_v50 = vadd.f32 %v663_v48, %v658_v4  ;;  %v664_v24 = vadd.f32 %v662_v22, %v657_v25  ;;  %v739_v48 = vmul.f32 %v1986_v44, %v737_v47  ;;  %v772_v44 = vmul.f32 %v2016_v3, %v770_v57 }
 0x121   : > { %v674_v8 = vpop.permute.xlu1 %673  ;;  %v672_v61 = vpop.permute.xlu0 %671  ;;  %p1561_p0 = pnand %p1560_p9, %p2434_p13 }
 0x122   : > { %v678_v26 = vadd.f32 %v674_v8, %v665_v50  ;;  %v677_v40 = vadd.f32 %v672_v61, %v664_v24  ;;  %v981_v50 = vmul.f32 %v1996_v51, %v979_v55  ;;  %v980_v24 = vmul.f32 %v1999_v53, %v979_v55 }
 0x123   : > { %p1562_p2 = pneg %p1561_p0 }
 0x125   : > { %v687_v62 = vpop.permute.xlu1 %686  ;;  %v685_v56 = vpop.permute.xlu0 %684 }
 0x126   : > { %v691_v42 = vadd.f32 %v687_v62, %v678_v26  ;;  %v690_v11 = vadd.f32 %v685_v56, %v677_v40  ;;  %v771_v62 = vmul.f32 %v2021_v6, %v770_v57 }
 0x128   : > { %1363 = vst.msk [vmem:[%s2188_s6 + $0x18] sm:$0xff] %vm450_vm0, %v691_v42  ;;  %1362 = vst.msk [vmem:[%s2188_s6 + $0x10] sm:$0xff] %vm450_vm0, %v690_v11  ;;  %v1012_v42 = vstv %s1399_s17  ;;  %s1563_s17 = sshll.u32 %s1653_s16, 4  ;;  %s1564_s17 = int_to_ptr.vmem [resolvable:$false] %s1563_s17 }
 0x129   : > { %v750_v33 = vpop.permute.xlu1 %749  ;;  %v748_v58 = vpop.permute.xlu0 %747  ;;  %p1566_p6 = scmp.lt.s32.totalorder %s2366_s19, %s1564_s17 }
 0x12a   : > { %v754_v25 = vadd.f32 %v750_v33, %v739_v48  ;;  %v753_v8 = vadd.f32 %v748_v58, %v738_v54  ;;  %v1014_v58 = vmul.f32 %v2029_v13, %v1012_v42  ;;  %v803_v48 = vstv %s2290_s23  ;;  %s1565_s23 = scalar_lea.vmem %s1564_s17, 2048 }
 0x12b   : > { %p1567_p1 = scmp.lt.s32.totalorder %s1565_s23, %s1559_s3 }
 0x12d   : > { %v992_v36 = vpop.permute.xlu1 %991  ;;  %v990_v19 = vpop.permute.xlu0 %989  ;;  %p1568_p7 = por %p1567_p1, %p1566_p6 }
 0x12e   : > { %v996_v56 = vadd.f32 %v992_v36, %v981_v50  ;;  %v995_v11 = vadd.f32 %v990_v19, %v980_v24  ;;  %v804_v50 = vmul.f32 %v2067_v59, %v803_v48 }
 0x12f   : > { %p1569_p12 = pnand %p1568_p7, %p1562_p2 }
 0x131   : > { %v763_v27 = vpop.permute.xlu1 %762  ;;  %v761_v28 = vpop.permute.xlu0 %760 }
 0x132   : > { %v767_v26 = vadd.f32 %v763_v27, %v754_v25  ;;  %v766_v40 = vadd.f32 %v761_v28, %v753_v8  ;;  %v1013_v28 = vmul.f32 %v2034_v17, %v1012_v42 }
 0x134   : > { %v774_v53 = vadd.f32 %v772_v44, %v767_v26  ;;  %v773_v47 = vadd.f32 %v771_v62, %v766_v40  ;;  %v837_v62 = vstv %s2309_s29 }
 0x135   : > { %v1005_v30 = vpop.permute.xlu1 %1004  ;;  %v1003_v12 = vpop.permute.xlu0 %1002 }
 0x136   : > { %v1009_v33 = vadd.f32 %v1005_v30, %v996_v56  ;;  %v1008_v3 = vadd.f32 %v1003_v12, %v995_v11  ;;  %v805_v30 = vmul.f32 %v2061_v52, %v803_v48  ;;  %v1045_v12 = vstv %s2300_s27 }
 0x137   : > { %v1046_v40 = vmul.f32 %v2085_v21, %v1045_v12  ;;  %v838_v11 = vmul.f32 %v2117_v63, %v837_v62  ;;  %v1079_v21 = vstv %s2314_s30 }
 0x138   : > { %v1016_v19 = vadd.f32 %v1014_v58, %v1009_v33  ;;  %v1015_v13 = vadd.f32 %v1013_v28, %v1008_v3  ;;  %v1080_v63 = vmul.f32 %v2135_v0, %v1079_v21 }
 0x139   : > { %v783_v16 = vpop.permute.xlu1 %782  ;;  %v781_v14 = vpop.permute.xlu0 %780 }
 0x13a   : > { %v787_v6 = vadd.f32 %v783_v16, %v774_v53  ;;  %v786_v54 = vadd.f32 %v781_v14, %v773_v47  ;;  %v1047_v14 = vmul.f32 %v2077_v5, %v1045_v12  ;;  %v870_v47 = vstv %s2319_s7 }
 0x13b   : > { %v903_v12 = vstv %s2336_s22 }
 0x13d   : > { %v1025_v31 = vpop.permute.xlu1 %1024  ;;  %v1023_v18 = vpop.permute.xlu0 %1022 }
 0x13e   : > { %v1029_v17 = vadd.f32 %v1025_v31, %v1016_v19  ;;  %v1028_v8 = vadd.f32 %v1023_v18, %v1015_v13 }
 0x141   : > { %v796_v37 = vpop.permute.xlu1 %795  ;;  %v794_v38 = vpop.permute.xlu0 %793 }
 0x142   : > { %v800_v55 = vadd.f32 %v796_v37, %v787_v6  ;;  %v799_v25 = vadd.f32 %v794_v38, %v786_v54  ;;  %v872_v6 = vmul.f32 %v2161_v7, %v870_v47 }
 0x144   : > { %v807_v16 = vadd.f32 %v805_v30, %v800_v55  ;;  %v806_v52 = vadd.f32 %v804_v50, %v799_v25  ;;  %v1112_v55 = vstv %s2327_s8 }
 0x145   : > { %v1038_v39 = vpop.permute.xlu1 %1037  ;;  %v1036_v34 = vpop.permute.xlu0 %1035 }
 0x146   : > { %v1042_v26 = vadd.f32 %v1038_v39, %v1029_v17  ;;  %v1041_v37 = vadd.f32 %v1036_v34, %v1028_v8  ;;  %v839_v39 = vmul.f32 %v2111_v60, %v837_v62  ;;  %v1081_v60 = vmul.f32 %v2128_v23, %v1079_v21 }
 0x148   : > { %v1049_v18 = vadd.f32 %v1047_v14, %v1042_v26  ;;  %v1048_v5 = vadd.f32 %v1046_v40, %v1041_v37  ;;  %v904_v37 = vmul.f32 %v2224_v20, %v903_v12 }
 0x149   : > { %v2274_v43 = vpop.permute.xlu1 %815  ;;  %v2276_v45 = vpop.permute.xlu0 %813 }
 0x14a   : > { %v820_v59 = vadd.f32 %v2274_v43, %v807_v16  ;;  %v819_v38 = vadd.f32 %v2276_v45, %v806_v52 }
 0x14d   : > { %v2278_v1 = vpop.permute.xlu1 %1057  ;;  %v2280_v2 = vpop.permute.xlu0 %1055 }
 0x14e   : > { %v1062_v33 = vadd.f32 %v2278_v1, %v1049_v18  ;;  %v1061_v43 = vadd.f32 %v2280_v2, %v1048_v5 }
 0x151   : > { %v829_v10 = vpop.permute.xlu1 %828  ;;  %v2282_v49 = vpop.permute.xlu0 %826 }
 0x152   : > { %v833_v42 = vadd.f32 %v829_v10, %v820_v59  ;;  %v832_v34 = vadd.f32 %v2282_v49, %v819_v38 }
 0x154   : > { %v841_v10 = vadd.f32 %v839_v39, %v833_v42  ;;  %v840_v49 = vadd.f32 %v838_v11, %v832_v34 }
 0x155   : > { %v2286_v22 = vpop.permute.xlu1 %1070  ;;  %v2288_v4 = vpop.permute.xlu0 %1068 }
 0x156   : > { %v1075_v53 = vadd.f32 %v2286_v22, %v1062_v33  ;;  %v1074_v3 = vadd.f32 %v2288_v4, %v1061_v43  ;;  %v871_v4 = vmul.f32 %v2167_v15, %v870_v47 }
 0x158   : > { %v1083_v48 = vadd.f32 %v1081_v60, %v1075_v53  ;;  %v1082_v54 = vadd.f32 %v1080_v63, %v1074_v3 }
 0x159   : > { %v2294_v61 = vpop.permute.xlu1 %849  ;;  %v2297_v46 = vpop.permute.xlu0 %847 }
 0x15a   : > { %v854_v1 = vadd.f32 %v2294_v61, %v841_v10  ;;  %v853_v2 = vadd.f32 %v2297_v46, %v840_v49 }
 0x15d   : > { %v2302_v51 = vpop.permute.xlu1 %1091  ;;  %v2305_v27 = vpop.permute.xlu0 %1089 }
 0x15e   : > { %v1096_v0 = vadd.f32 %v2302_v51, %v1083_v48  ;;  %v1095_v61 = vadd.f32 %v2305_v27, %v1082_v54  ;;  %v905_v51 = vmul.f32 %v2218_v9, %v903_v12 }
 0x161   : > { %v863_v36 = vpop.permute.xlu1 %862  ;;  %v861_v57 = vpop.permute.xlu0 %860 }
 0x162   : > { %v867_v22 = vadd.f32 %v863_v36, %v854_v1  ;;  %v866_v19 = vadd.f32 %v861_v57, %v853_v2  ;;  %v1114_v36 = vmul.f32 %v2177_v29, %v1112_v55  ;;  %v1113_v57 = vmul.f32 %v2184_v32, %v1112_v55 }
 0x163   : > { %v1145_v29 = vstv %s2343_s24 }
 0x164   : > { %v874_v13 = vadd.f32 %v872_v6, %v867_v22  ;;  %v873_v50 = vadd.f32 %v871_v4, %v866_v19  ;;  %v1147_v59 = vmul.f32 %v2235_v35, %v1145_v29  ;;  %v1146_v18 = vmul.f32 %v2242_v41, %v1145_v29 }
 0x165   : > { %v1105_v24 = vpop.permute.xlu1 %1104  ;;  %v1103_v44 = vpop.permute.xlu0 %1102 }
 0x166   : > { %v1109_v46 = vadd.f32 %v1105_v24, %v1096_v0  ;;  %v1108_v25 = vadd.f32 %v1103_v44, %v1095_v61 }
 0x168   : > { %v1116_v26 = vadd.f32 %v1114_v36, %v1109_v46  ;;  %v1115_v14 = vadd.f32 %v1113_v57, %v1108_v25 }
 0x169   : > { %v883_v31 = vpop.permute.xlu1 %882  ;;  %v881_v56 = vpop.permute.xlu0 %880 }
 0x16a   : > { %v887_v15 = vadd.f32 %v883_v31, %v874_v13  ;;  %v886_v17 = vadd.f32 %v881_v56, %v873_v50 }
 0x16d   : > { %v1125_v45 = vpop.permute.xlu1 %1124  ;;  %v1123_v58 = vpop.permute.xlu0 %1122 }
 0x16e   : > { %v1129_v52 = vadd.f32 %v1125_v45, %v1116_v26  ;;  %v1128_v40 = vadd.f32 %v1123_v58, %v1115_v14 }
 0x171   : > { %v896_v28 = vpop.permute.xlu1 %895  ;;  %v894_v23 = vpop.permute.xlu0 %893 }
 0x172   : > { %v900_v16 = vadd.f32 %v896_v28, %v887_v15  ;;  %v899_v24 = vadd.f32 %v894_v23, %v886_v17 }
 0x174   : > { %v907_v32 = vadd.f32 %v905_v51, %v900_v16  ;;  %v906_v9 = vadd.f32 %v904_v37, %v899_v24 }
 0x175   : > { %v1138_v30 = vpop.permute.xlu1 %1137  ;;  %v1136_v7 = vpop.permute.xlu0 %1135 }
 0x176   : > { %v1142_v62 = vadd.f32 %v1138_v30, %v1129_v52  ;;  %v1141_v31 = vadd.f32 %v1136_v7, %v1128_v40 }
 0x178   : > { %v1149_v56 = vadd.f32 %v1147_v59, %v1142_v62  ;;  %v1148_v11 = vadd.f32 %v1146_v18, %v1141_v31 }
 0x179   : > { %v916_v8 = vpop.permute.xlu1 %915  ;;  %v914_v27 = vpop.permute.xlu0 %913 }
 0x17a   : > { %v920_v42 = vadd.f32 %v916_v8, %v907_v32  ;;  %v919_v39 = vadd.f32 %v914_v27, %v906_v9 }
 0x17d   : > { %v1158_v44 = vpop.permute.xlu1 %1157  ;;  %v1156_v38 = vpop.permute.xlu0 %1155 }
 0x17e   : > { %v1162_v35 = vadd.f32 %v1158_v44, %v1149_v56  ;;  %v1161_v33 = vadd.f32 %v1156_v38, %v1148_v11 }
 0x181   : > { %v929_v20 = vpop.permute.xlu1 %928  ;;  %v927_v34 = vpop.permute.xlu0 %926 }
 0x182   : > { %v933_v5 = vadd.f32 %v929_v20, %v920_v42  ;;  %v932_v21 = vadd.f32 %v927_v34, %v919_v39 }
 0x184   : > { %1395 = vst.msk [vmem:[%s2188_s6 + $0x28] sm:$0xff] %vm450_vm0, %v933_v5  ;;  %1394 = vst.msk [vmem:[%s2188_s6 + $0x20] sm:$0xff] %vm450_vm0, %v932_v21 }
 0x185   : > { %v1171_v41 = vpop.permute.xlu1 %1170  ;;  %v1169_v45 = vpop.permute.xlu0 %1168 }
 0x186   : > { %v1175_v43 = vadd.f32 %v1171_v41, %v1162_v35  ;;  %v1174_v53 = vadd.f32 %v1169_v45, %v1161_v33 }
 0x188   : > { %1427 = vst.msk [vmem:[%s2188_s6 + $0x38] sm:$0xff] %vm450_vm0, %v1175_v43  ;;  %1426 = vst.msk [vmem:[%s2188_s6 + $0x30] sm:$0xff] %vm450_vm0, %v1174_v53 }
 0x189   : > { %1572 = shalt.err (!%p1569_p12)
}
 0x18a   : > { %s1573_s6 = scalar_lea.hbm %s2364_s18, 1024  ;;  %s1577_s30 = scalar_lea.hbm %s2421_s2, 2048 }
 0x18b   : > { %p1574_p4 = scmp.ne.s32.totalorder %s2364_s18, %s1573_s6  ;;  %p1578_p5 = scmp.lt.u32.totalorder %s2364_s18, %s2421_s2 }
 0x18c   : > { %p1579_p3 = scmp.lt.u32.totalorder %s1577_s30, %s1573_s6  ;;  %p1581_p9 = scmp.lt.u32.totalorder %s1573_s6, %s2364_s18 }
 0x18d   : > { %p1575_p10 = pnand %p1574_p4, %p2434_p13 }
 0x18e   : > { %p1580_p8 = por %p1579_p3, %p1578_p5 }
 0x18f   : > { %p1576_p11 = pneg %p1575_p10 }
 0x190   : > { %p1582_p0 = por %p1581_p9, %p1580_p8 }
 0x192   : > { %p1583_p2 = pnand %p1582_p0, %p1576_p11 }
 0x194   : > { %1586 = shalt.err (!%p1583_p2)
}
 0x195   : > { %s1654_s22 = smov 128   ;;  %s1655_s24 = smov 8  }
 0x196   : > { %1443 = dma.vmem_to_hbm [thread:$0]  (%p2434_p13), %s2366_s19, 1024, %s2364_s18, %s1180_s12, %s1654_s22, %s1654_s22, %s1655_s24  }
 0x197 PF: > { %s1211_s28 = sand.u32 1, %s1625_s9   ;;  %p2435_p6 = scmp.ne.s32.totalorder %s2429_s21, 0 }
 0x198   : > { %p2436_p1 = scmp.ge.s32.totalorder %s1645_s14, 2  ;;  %s1212_s5 = scalar_lea.sflag [#allocation4], %s1211_s28 }
 0x19a   : > { %p1454_p7 = pnand %p2436_p1, %p2435_p6 }
 0x19c   : > { %1620 = dma.done.wait (!%p1454_p7), %s1212_s5, 1024  }
 0x19d   : > { %1622 = vsyncadd (!%p1454_p7), %s1212_s5, 4294966272  ;;  %s19_s14 = sadd.s32 1, %s1645_s14   ;;  %s2437_s9 = smov %s1629_s10 }
 0x19e   : > { %p16_p12 = scmp.ge.s32.totalorder %s19_s14, 4   ;;  %s2438_s10 = smov %s1633_s11 }
 0x19f   : > { %s2439_s11 = smov %s1772_s4  ;;  %s2440_s12 = smov %s1641_s13 }
 0x1a0   : > { %s2441_s13 = smov %s2443_s25  ;;  %18 = sbr.rel (!%p16_p12) target bundleno = 7 (0x7), region = 88 }
 0x1a7   :  { %1217 = vsyncpa [#allocation3], 1 }
 0x1a8   :  { %1219 = vsyncpa [#allocation3 + $0x1], 1 }
 0x1a9   :  { %1220 = vsyncpa [#allocation4], 1 }
 0x1aa   :  { %1222 = vsyncpa [#allocation4 + $0x1], 1 }
 0x1ab   :  { %1223 = vsyncpa [#allocation5], 1 }
 0x1ac   :  { %1225 = vsyncpa [#allocation5 + $0x1], 1 }

</bundles_post_ra>
